<compile_context>
chip_gen: v7x
topology: tpu7x:2x2x1
jax: 0.10.0
libtpu: 0.0.40
codegen_flags: <defaults>
</compile_context>

<pallas_src>
import functools
import math

import jax
import jax.numpy as jnp
import numpy as np
from jax import lax
from jax.experimental import pallas as pl
from jax.experimental.pallas import tpu as pltpu

EPS = 1e-6  # nn.RMSNorm eps used by torchtitan's build_norm("rmsnorm")


def _swap01(t):
    """(A, B, C) -> (B, A, C), minor (lane) dim preserved."""
    try:
        return pltpu.einshape("abc->bac", t)      # lane-layout aware transpose
    except Exception:                             # pragma: no cover - API fallback
        return jnp.swapaxes(t, 0, 1)


# ---------------------------------------------------------------------------
# Kernel
# ---------------------------------------------------------------------------
def transformer_block_kernel(x_ref, wq_ref, wk_ref, wv_ref, wo_ref,
                             w1_ref, w2_ref, w3_ref, anw_ref, fnw_ref,
                             cos_ref, sin_ref,
                             o_ref,
                             hn_ref,
                             *, n_heads, n_kv_heads, head_dim, attn_tile):
    hd = head_dim
    hd2 = hd // 2
    n_rep = n_heads // n_kv_heads
    G = n_kv_heads
    T = attn_tile
    f_idx = pl.program_id(1)

    def rmsnorm(v, w):                            # f32 in, f32 out
        ms = jnp.mean(v * v, axis=-1, keepdims=True)
        return v * lax.rsqrt(ms + EPS) * w

    # ---- attention + residual 1, once per batch element -------------------
    @pl.when(f_idx == 0)
    def _attention():
        x = x_ref[...]                            # (S, D) f32
        S = x.shape[0]
        n_qt = S // T
        xn = rmsnorm(x, anw_ref[...]).astype(jnp.bfloat16)

        q2 = jnp.dot(xn, wq_ref[...], preferred_element_type=jnp.float32)
        k2 = jnp.dot(xn, wk_ref[...], preferred_element_type=jnp.float32)
        v2 = jnp.dot(xn, wv_ref[...], preferred_element_type=jnp.float32)

        cos = cos_ref[...][None]                  # (1, S, hd)
        sin = sin_ref[...][None]

        def rope(t):                              # rotate-half RoPE, f32
            rot = jnp.concatenate([-t[..., hd2:], t[..., :hd2]], axis=-1)
            return t * cos + rot * sin

        scale = 1.0 / math.sqrt(hd)
        # Head-major layouts; softmax scale folded into q (O(S*D), not O(H*S^2)).
        q_h = (rope(_swap01(q2.reshape(S, n_heads, hd))) * scale
               ).astype(jnp.bfloat16)             # (H, S, hd)
        k_g = rope(_swap01(k2.reshape(S, G, hd))).astype(jnp.bfloat16)   # (G, S, hd)
        v_g = _swap01(v2.reshape(S, G, hd)).astype(jnp.bfloat16)         # (G, S, hd)

        wo = wo_ref[...]                          # (D, D) bf16
        fnw = fnw_ref[...]

        # Causal mask for a diagonal (Tq == Tk) block, laid out for the
        # GQA-flattened (n_rep * T) query axis.
        row_l = jnp.tile(lax.broadcasted_iota(jnp.int32, (T, T), 0), (n_rep, 1))
        col_l = jnp.tile(lax.broadcasted_iota(jnp.int32, (T, T), 1), (n_rep, 1))
        diag_keep = (col_l <= row_l)[None]        # (1, n_rep*T, T)

        for qi in range(n_qt):                    # flash-style online softmax
            qs = qi * T
            # (G, n_rep*T, hd): reshape only regroups leading dims (no data move).
            q_t = q_h[:, qs:qs + T, :].reshape(G, n_rep * T, hd)
            m_i = jnp.full((G, n_rep * T, 1), -1e30, jnp.float32)
            l_i = jnp.zeros((G, n_rep * T, 1), jnp.float32)
            acc = jnp.zeros((G, n_rep * T, hd), jnp.float32)

            for kj in range(qi + 1):              # skip fully-masked KV blocks
                ks = kj * T
                k_t = k_g[:, ks:ks + T, :]
                v_t = v_g[:, ks:ks + T, :]
                s = jnp.einsum('gqd,gkd->gqk', q_t, k_t,
                               preferred_element_type=jnp.float32)  # (G,R*T,T)
                if kj == qi:                      # diagonal block only
                    s = jnp.where(diag_keep, s, jnp.float32(-1e30))
                m_new = jnp.maximum(m_i, jnp.max(s, axis=-1, keepdims=True))
                alpha = jnp.exp(m_i - m_new)
                p = jnp.exp(s - m_new)
                l_i = alpha * l_i + jnp.sum(p, axis=-1, keepdims=True)
                acc = alpha * acc + jnp.einsum('gqk,gkd->gqd',
                                               p.astype(jnp.bfloat16), v_t,
                                               preferred_element_type=jnp.float32)
                m_i = m_new

            # Normalize O(T*hd) accumulator values rather than O(T*S) probs.
            o_t = acc * pl.reciprocal(l_i, approx=True)
            # Merge heads -> (T, D) bf16 and feed one lane-dense WO matmul.
            o_t = _swap01(o_t.reshape(n_heads, T, hd))        # (T, H, hd)
            o_t = o_t.reshape(T, n_heads * hd).astype(jnp.bfloat16)
            attn = jnp.dot(o_t, wo, preferred_element_type=jnp.float32)

            h_t = x[qs:qs + T, :] + attn          # residual 1, f32
            o_ref[qs:qs + T, :] = h_t             # init residual-2 accumulator
            hn_ref[qs:qs + T, :] = rmsnorm(h_t, fnw).astype(jnp.bfloat16)

    # ---- SwiGLU FFN, tiled over the hidden dim (grid axis 1, "arbitrary") --
    # NOTE: correctness relies on the FFN-tile axis being the innermost,
    # sequential grid axis (iterated immediately after f == 0 for the same b).
    hn = hn_ref[...]                              # (S, D) bf16
    a1 = jnp.dot(hn, w1_ref[...], preferred_element_type=jnp.float32)
    a3 = jnp.dot(hn, w3_ref[...], preferred_element_type=jnp.float32)
    gated = (jax.nn.silu(a1) * a3).astype(jnp.bfloat16)
    o_ref[...] = o_ref[...] + jnp.dot(gated, w2_ref[...],
                                      preferred_element_type=jnp.float32)


# ---------------------------------------------------------------------------
# Wrapper: host-side weight permutation / casting / table building + pallas_call
# ---------------------------------------------------------------------------
def transformer_block(x, params, *, n_heads, n_kv_heads,
                      ff_tile=None, attn_tile=None):
    bs, S, D = x.shape
    assert D % n_heads == 0 and n_heads % n_kv_heads == 0
    hd = D // n_heads
    assert hd % 2 == 0
    Dkv = n_kv_heads * hd
    F = params["w1T"].shape[1]
    if ff_tile is None:
        ff_tile = F if F <= 256 else 256          # v7x-friendly (64 MiB VMEM)
    assert F % ff_tile == 0
    nF = F // ff_tile
    if attn_tile is None:
        attn_tile = S
        for t in (256, 128):
            if S % t == 0:
                attn_tile = t
                break
    assert S % attn_tile == 0

    # Per-head de-interleave permutation ([0,2,...,1,3,...] within each head):
    # turns interleaved-pair RoPE into the rotate-half form inside the kernel.
    def deint_perm(num_h):
        per_head = np.concatenate([np.arange(0, hd, 2), np.arange(1, hd, 2)])
        return np.concatenate([h * hd + per_head for h in range(num_h)])

    bf = jnp.bfloat16
    wq = params["wqT"][:, deint_perm(n_heads)].astype(bf)
    wk = params["wkT"][:, deint_perm(n_kv_heads)].astype(bf)
    wv = params["wvT"].astype(bf)
    wo = params["woT"].astype(bf)
    w1 = params["w1T"].astype(bf)
    w2 = params["w2T"].astype(bf)
    w3 = params["w3T"].astype(bf)

    # Rotate-half RoPE tables, (S, hd): [cos|cos], [sin|sin].
    cos = params["rope_cos"][:S].astype(jnp.float32)          # (S, hd//2)
    sin = params["rope_sin"][:S].astype(jnp.float32)
    cos_rh = jnp.concatenate([cos, cos], axis=1)
    sin_rh = jnp.concatenate([sin, sin], axis=1)

    def const_spec(shape):
        # Constant block index for every grid step -> single-buffer it: no
        # duplicate DMA and half the VMEM of the default double buffer.
        nd = len(shape)
        idx = lambda b, f, _nd=nd: (0,) * _nd
        try:
            return pl.BlockSpec(shape, idx, pipeline_mode=pl.Buffered(1))
        except (TypeError, AttributeError):       # older API fallback
            return pl.BlockSpec(shape, idx)

    in_specs = [
        pl.BlockSpec((pl.Squeezed(), S, D), lambda b, f: (b, 0, 0)),  # x
        const_spec((D, D)),                                           # wq (permuted)
        const_spec((D, Dkv)),                                         # wk (permuted)
        const_spec((D, Dkv)),                                         # wv
        const_spec((D, D)),                                           # wo
        pl.BlockSpec((D, ff_tile), lambda b, f: (0, f)),              # w1 tile
        pl.BlockSpec((ff_tile, D), lambda b, f: (f, 0)),              # w2 tile
        pl.BlockSpec((D, ff_tile), lambda b, f: (0, f)),              # w3 tile
        const_spec((1, D)),                                           # attn norm
        const_spec((1, D)),                                           # ffn norm
        const_spec((S, hd)),                                          # cos
        const_spec((S, hd)),                                          # sin
    ]
    out_spec = pl.BlockSpec((pl.Squeezed(), S, D), lambda b, f: (b, 0, 0))

    scratch = [pltpu.VMEM((S, D), jnp.bfloat16)]  # normalized h for FFN tiles

    kernel = functools.partial(transformer_block_kernel,
                               n_heads=n_heads, n_kv_heads=n_kv_heads,
                               head_dim=hd, attn_tile=attn_tile)

    def nbytes(shape, dt):
        return int(np.prod(shape)) * jnp.dtype(dt).itemsize

    vmem_est = (
        2 * nbytes((S, D), jnp.float32)           # x (double-buffered)
        + 2 * nbytes((S, D), jnp.float32)         # output block
        + 2 * nbytes((D, D), bf) + 2 * nbytes((D, Dkv), bf)   # single-buffered wq/wo/wk/wv
        + 2 * (2 * nbytes((D, ff_tile), bf) + nbytes((ff_tile, D), bf))
        + 2 * nbytes((1, D), jnp.float32) + 2 * nbytes((S, hd), jnp.float32)
        + nbytes((S, D), jnp.bfloat16)            # hn scratch
        # live attention values: roped q/k/v + one score block + running acc
        + nbytes((n_heads, S, hd), jnp.float32)
        + nbytes((n_heads, S, hd), jnp.bfloat16)
        + 2 * nbytes((n_kv_heads, S, hd), jnp.bfloat16)
        + 2 * nbytes((n_heads, attn_tile, attn_tile), jnp.float32)
        + nbytes((n_heads, attn_tile, hd), jnp.float32))
    vmem_limit = int(min(110 * 2**20, max(32 * 2**20, 2 * vmem_est)))

    flops = int(2 * bs * S * D * (2 * D + 2 * Dkv)       # QKV + WO projections
                + 2 * bs * n_heads * S * S * hd          # scores + PV (~causal)
                + 2 * bs * S * D * F * 3)                # SwiGLU FFN
    transcendentals = int(bs * n_heads * S * S // 2 + bs * S * F)
    bytes_accessed = int(bs * S * D * 8
                         + bs * 2 * (2 * D * D + 2 * D * Dkv + 3 * D * F)
                         + 2 * S * hd * 4 + 2 * D * 4)

    return pl.pallas_call(
        kernel,
        out_shape=jax.ShapeDtypeStruct((bs, S, D), jnp.float32),
        grid_spec=pltpu.PrefetchScalarGridSpec(
            num_scalar_prefetch=0,
            grid=(bs, nF),
            in_specs=in_specs,
            out_specs=out_spec,
            scratch_shapes=scratch),
        compiler_params=pltpu.CompilerParams(
            dimension_semantics=("parallel", "arbitrary"),
            vmem_limit_bytes=vmem_limit),
        cost_estimate=pl.CostEstimate(flops=flops,
                                      transcendentals=transcendentals,
                                      bytes_accessed=bytes_accessed),
    )(x, wq, wk, wv, wo, w1, w2, w3,
      params["attn_norm"], params["ffn_norm"], cos_rh, sin_rh)


# ---------------------------------------------------------------------------
# Pure-JAX f32 reference (mirrors the PyTorch module), used for verification.
# ---------------------------------------------------------------------------
def reference(x, params, *, n_heads, n_kv_heads):
    with jax.default_matmul_precision("float32"):
        bs, S, D = x.shape
        hd = D // n_heads
        n_rep = n_heads // n_kv_heads
        cos = params["rope_cos"][:S]
        sin = params["rope_sin"][:S]

        def rmsnorm(v, w):
            return v * lax.rsqrt(jnp.mean(v * v, -1, keepdims=True) + EPS) * w

        def rope(t):  # (bs, S, H, hd), interleaved-pair RoPE
            a = t[..., 0::2]
            b = t[..., 1::2]
            c = cos[None, :, None, :]
            s = sin[None, :, None, :]
            return jnp.stack([a * c - b * s, a * s + b * c], axis=-1).reshape(t.shape)

        xn = rmsnorm(x, params["attn_norm"][0])
        q = (xn @ params["wqT"]).reshape(bs, S, n_heads, hd)
        k = (xn @ params["wkT"]).reshape(bs, S, n_kv_heads, hd)
        v = (xn @ params["wvT"]).reshape(bs, S, n_kv_heads, hd)
        q, k = rope(q), rope(k)
        k = jnp.repeat(k, n_rep, axis=2)
        v = jnp.repeat(v, n_rep, axis=2)
        scores = jnp.einsum("bqhd,bkhd->bhqk", q, k) / math.sqrt(hd)
        mask = jnp.tril(jnp.ones((S, S), bool))
        scores = jnp.where(mask[None, None], scores, -jnp.inf)
        p = jax.nn.softmax(scores, axis=-1)
        o = jnp.einsum("bhqk,bkhd->bqhd", p, v).reshape(bs, S, D)
        attn = o @ params["woT"]
        h = x + attn
        hn = rmsnorm(h, params["ffn_norm"][0])
        ff = (jax.nn.silu(hn @ params["w1T"]) * (hn @ params["w3T"])) @ params["w2T"]
        return h + ff


# ---------------------------------------------------------------------------
if __name__ == "__main__":
    # Small config consistent with TransformerBlock(..., head_dim=D, ...).
    bs, S = 2, 16
    n_heads, n_kv_heads = 4, 2
    D = 32                     # "head_dim" arg of Attention == model dim
    hd = D // n_heads          # per-head dim = 8
    Dkv = n_kv_heads * hd      # 16
    F = 256                    # ffwd_hidden (tiled over the FFN grid axis)
    theta = 10000.0

    key = jax.random.PRNGKey(0)
    ks = jax.random.split(key, 8)
    std = 0.02
    params = {
        "wqT": (jax.random.normal(ks[0], (D, D)) * std).astype(jnp.float32),
        "wkT": (jax.random.normal(ks[1], (D, Dkv)) * std).astype(jnp.float32),
        "wvT": (jax.random.normal(ks[2], (D, Dkv)) * std).astype(jnp.float32),
        "woT": (jax.random.normal(ks[3], (D, D)) * std).astype(jnp.float32),
        "w1T": (jax.random.normal(ks[4], (D, F)) * std).astype(jnp.float32),
        "w2T": (jax.random.normal(ks[5], (F, D)) * std).astype(jnp.float32),
        "w3T": (jax.random.normal(ks[6], (D, F)) * std).astype(jnp.float32),
        "attn_norm": jnp.ones((1, D), jnp.float32),   # nn.RMSNorm default weight
        "ffn_norm": jnp.ones((1, D), jnp.float32),
    }

    # RoPE tables: angles = outer(t, 1/theta^(2j/hd)), first S rows, (S, hd//2)
    freqs = 1.0 / theta ** (np.arange(0, hd, 2)[: hd // 2].astype(np.float32) / hd)
    t = np.arange(S, dtype=np.float32)
    ang = np.outer(t, freqs)
    params["rope_cos"] = jnp.asarray(np.cos(ang), jnp.float32)
    params["rope_sin"] = jnp.asarray(np.sin(ang), jnp.float32)

    x = jax.random.normal(ks[7], (bs, S, D), jnp.float32)

    # attn_tile=8 -> 2 Q tiles / 2 KV tiles: exercises the online-softmax path,
    # the fully-unmasked off-diagonal block and the causal diagonal block.
    out = transformer_block(x, params, n_heads=n_heads, n_kv_heads=n_kv_heads,
                            ff_tile=128, attn_tile=8)
    out = jax.block_until_ready(out)

    ref = reference(x, params, n_heads=n_heads, n_kv_heads=n_kv_heads)
    np.testing.assert_allclose(np.asarray(out), np.asarray(ref),
                               rtol=2e-2, atol=2e-2)

    print("KERNEL_OK")
</pallas_src>

<mosaic_0001>
module attributes {stable_mosaic.version = 11 : i64} {
  func.func @transformer_block_kernel(%arg0: i32, %arg1: i32, %arg2: memref<1x16x32xf32, #tpu.memory_space<vmem>>, %arg3: memref<32x32xbf16, #tpu.memory_space<vmem>>, %arg4: memref<32x16xbf16, #tpu.memory_space<vmem>>, %arg5: memref<32x16xbf16, #tpu.memory_space<vmem>>, %arg6: memref<32x32xbf16, #tpu.memory_space<vmem>>, %arg7: memref<32x128xbf16, #tpu.memory_space<vmem>>, %arg8: memref<128x32xbf16, #tpu.memory_space<vmem>>, %arg9: memref<32x128xbf16, #tpu.memory_space<vmem>>, %arg10: memref<1x32xf32, #tpu.memory_space<vmem>>, %arg11: memref<1x32xf32, #tpu.memory_space<vmem>>, %arg12: memref<16x8xf32, #tpu.memory_space<vmem>>, %arg13: memref<16x8xf32, #tpu.memory_space<vmem>>, %arg14: memref<1x16x32xf32, #tpu.memory_space<vmem>>, %arg15: memref<16x32xbf16, #tpu.memory_space<vmem>>) attributes {dimension_semantics = [#tpu.dimension_semantics<parallel>, #tpu.dimension_semantics<arbitrary>], iteration_bounds = array<i64: 2, 2>, scalar_prefetch = 0 : i64, scratch_operands = 1 : i64, tpu.core_type = #tpu.core_type<tc>, window_params = [{transform_indices = @transform_0, window_bounds = array<i64: 1, 16, 32>}, {pipeline_mode = #tpu.pipeline_mode<synchronous>, transform_indices = @transform_1, window_bounds = array<i64: 32, 32>}, {pipeline_mode = #tpu.pipeline_mode<synchronous>, transform_indices = @transform_2, window_bounds = array<i64: 32, 16>}, {pipeline_mode = #tpu.pipeline_mode<synchronous>, transform_indices = @transform_3, window_bounds = array<i64: 32, 16>}, {pipeline_mode = #tpu.pipeline_mode<synchronous>, transform_indices = @transform_4, window_bounds = array<i64: 32, 32>}, {transform_indices = @transform_5, window_bounds = array<i64: 32, 128>}, {transform_indices = @transform_6, window_bounds = array<i64: 128, 32>}, {transform_indices = @transform_7, window_bounds = array<i64: 32, 128>}, {pipeline_mode = #tpu.pipeline_mode<synchronous>, transform_indices = @transform_8, window_bounds = array<i64: 1, 32>}, {pipeline_mode = #tpu.pipeline_mode<synchronous>, transform_indices = @transform_9, window_bounds = array<i64: 1, 32>}, {pipeline_mode = #tpu.pipeline_mode<synchronous>, transform_indices = @transform_10, window_bounds = array<i64: 16, 8>}, {pipeline_mode = #tpu.pipeline_mode<synchronous>, transform_indices = @transform_11, window_bounds = array<i64: 16, 8>}, {transform_indices = @transform_12, window_bounds = array<i64: 1, 16, 32>}]} {
    %c0_i32 = arith.constant 0 : i32
    %0 = arith.cmpi eq, %arg1, %c0_i32 : i32
    %1 = arith.extui %0 : i1 to i32
    %c0_i32_0 = arith.constant 0 : i32
    %2 = arith.cmpi ne, %1, %c0_i32_0 : i32
    scf.if %2 {
      %c0_17 = arith.constant 0 : index
      %c0_18 = arith.constant 0 : index
      %c0_19 = arith.constant 0 : index
      %24 = vector.load %arg2[%c0_17, %c0_18, %c0_19] : memref<1x16x32xf32, #tpu.memory_space<vmem>>, vector<1x16x32xf32>
      %25 = vector.shape_cast %24 : vector<1x16x32xf32> to vector<16x32xf32>
      %c0_20 = arith.constant 0 : index
      %c0_21 = arith.constant 0 : index
      %26 = vector.load %arg10[%c0_20, %c0_21] : memref<1x32xf32, #tpu.memory_space<vmem>>, vector<1x32xf32>
      %27 = arith.mulf %25, %25 : vector<16x32xf32>
      %cst_22 = arith.constant dense<0.000000e+00> : vector<16xf32>
      %28 = vector.multi_reduction <add>, %27, %cst_22 [1] : vector<16x32xf32> to vector<16xf32>
      %29 = vector.shape_cast %28 : vector<16xf32> to vector<16x1xf32>
      %cst_23 = arith.constant 3.200000e+01 : f32
      %30 = vector.broadcast %cst_23 : f32 to vector<16x1xf32>
      %31 = arith.divf %29, %30 : vector<16x1xf32>
      %cst_24 = arith.constant 9.99999997E-7 : f32
      %32 = vector.broadcast %cst_24 : f32 to vector<16x1xf32>
      %33 = arith.addf %31, %32 : vector<16x1xf32>
      %34 = math.rsqrt %33 : vector<16x1xf32>
      %35 = vector.broadcast %34 : vector<16x1xf32> to vector<16x32xf32>
      %36 = arith.mulf %25, %35 : vector<16x32xf32>
      %37 = vector.broadcast %26 : vector<1x32xf32> to vector<16x32xf32>
      %38 = arith.mulf %36, %37 : vector<16x32xf32>
      %39 = arith.truncf %38 : vector<16x32xf32> to vector<16x32xbf16>
      %c0_25 = arith.constant 0 : index
      %c0_26 = arith.constant 0 : index
      %40 = vector.load %arg3[%c0_25, %c0_26] : memref<32x32xbf16, #tpu.memory_space<vmem>>, vector<32x32xbf16>
      %cst_27 = arith.constant dense<0.000000e+00> : vector<16x32xf32>
      %41 = tpu.matmul %39, %40, %cst_27 {dimension_numbers = #tpu.dot_dimension_numbers<[1], [0], [0], [1], [0, 0, 1, 1], [], []>} : vector<16x32xbf16>, vector<32x32xbf16>, vector<16x32xf32> -> vector<16x32xf32>
      %c0_28 = arith.constant 0 : index
      %c0_29 = arith.constant 0 : index
      %42 = vector.load %arg4[%c0_28, %c0_29] : memref<32x16xbf16, #tpu.memory_space<vmem>>, vector<32x16xbf16>
      %cst_30 = arith.constant dense<0.000000e+00> : vector<16x16xf32>
      %43 = tpu.matmul %39, %42, %cst_30 {dimension_numbers = #tpu.dot_dimension_numbers<[1], [0], [0], [1], [0, 0, 1, 1], [], []>} : vector<16x32xbf16>, vector<32x16xbf16>, vector<16x16xf32> -> vector<16x16xf32>
      %c0_31 = arith.constant 0 : index
      %c0_32 = arith.constant 0 : index
      %44 = vector.load %arg5[%c0_31, %c0_32] : memref<32x16xbf16, #tpu.memory_space<vmem>>, vector<32x16xbf16>
      %cst_33 = arith.constant dense<0.000000e+00> : vector<16x16xf32>
      %45 = tpu.matmul %39, %44, %cst_33 {dimension_numbers = #tpu.dot_dimension_numbers<[1], [0], [0], [1], [0, 0, 1, 1], [], []>} : vector<16x32xbf16>, vector<32x16xbf16>, vector<16x16xf32> -> vector<16x16xf32>
      %c0_34 = arith.constant 0 : index
      %c0_35 = arith.constant 0 : index
      %46 = vector.load %arg12[%c0_34, %c0_35] : memref<16x8xf32, #tpu.memory_space<vmem>>, vector<16x8xf32>
      %47 = vector.shape_cast %46 : vector<16x8xf32> to vector<1x16x8xf32>
      %c0_36 = arith.constant 0 : index
      %c0_37 = arith.constant 0 : index
      %48 = vector.load %arg13[%c0_36, %c0_37] : memref<16x8xf32, #tpu.memory_space<vmem>>, vector<16x8xf32>
      %49 = vector.shape_cast %48 : vector<16x8xf32> to vector<1x16x8xf32>
      %50 = vector.shape_cast %41 : vector<16x32xf32> to vector<16x4x8xf32>
      %51 = tpu.transpose %50, [1, 0, 2] : vector<16x4x8xf32> -> vector<4x16x8xf32>
      %52 = vector.extract_strided_slice %51 {offsets = [0, 0, 4], sizes = [4, 16, 4], strides = [1, 1, 1]} : vector<4x16x8xf32> to vector<4x16x4xf32>
      %cst_38 = arith.constant 0.000000e+00 : f32
      %53 = vector.broadcast %cst_38 : f32 to vector<4x16x4xf32>
      %54 = arith.subf %53, %52 : vector<4x16x4xf32>
      %55 = vector.extract_strided_slice %51 {offsets = [0, 0, 0], sizes = [4, 16, 4], strides = [1, 1, 1]} : vector<4x16x8xf32> to vector<4x16x4xf32>
      %56 = tpu.concatenate %54, %55 in 2 : vector<4x16x4xf32>, vector<4x16x4xf32> -> vector<4x16x8xf32>
      %57 = vector.broadcast %47 : vector<1x16x8xf32> to vector<4x16x8xf32>
      %58 = arith.mulf %51, %57 : vector<4x16x8xf32>
      %59 = vector.broadcast %49 : vector<1x16x8xf32> to vector<4x16x8xf32>
      %60 = arith.mulf %56, %59 : vector<4x16x8xf32>
      %61 = arith.addf %58, %60 : vector<4x16x8xf32>
      %cst_39 = arith.constant 0.353553385 : f32
      %62 = vector.broadcast %cst_39 : f32 to vector<4x16x8xf32>
      %63 = arith.mulf %61, %62 : vector<4x16x8xf32>
      %64 = arith.truncf %63 : vector<4x16x8xf32> to vector<4x16x8xbf16>
      %65 = vector.shape_cast %43 : vector<16x16xf32> to vector<16x2x8xf32>
      %66 = tpu.transpose %65, [1, 0, 2] : vector<16x2x8xf32> -> vector<2x16x8xf32>
      %67 = vector.extract_strided_slice %66 {offsets = [0, 0, 4], sizes = [2, 16, 4], strides = [1, 1, 1]} : vector<2x16x8xf32> to vector<2x16x4xf32>
      %cst_40 = arith.constant 0.000000e+00 : f32
      %68 = vector.broadcast %cst_40 : f32 to vector<2x16x4xf32>
      %69 = arith.subf %68, %67 : vector<2x16x4xf32>
      %70 = vector.extract_strided_slice %66 {offsets = [0, 0, 0], sizes = [2, 16, 4], strides = [1, 1, 1]} : vector<2x16x8xf32> to vector<2x16x4xf32>
      %71 = tpu.concatenate %69, %70 in 2 : vector<2x16x4xf32>, vector<2x16x4xf32> -> vector<2x16x8xf32>
      %72 = vector.broadcast %47 : vector<1x16x8xf32> to vector<2x16x8xf32>
      %73 = arith.mulf %66, %72 : vector<2x16x8xf32>
      %74 = vector.broadcast %49 : vector<1x16x8xf32> to vector<2x16x8xf32>
      %75 = arith.mulf %71, %74 : vector<2x16x8xf32>
      %76 = arith.addf %73, %75 : vector<2x16x8xf32>
      %77 = arith.truncf %76 : vector<2x16x8xf32> to vector<2x16x8xbf16>
      %78 = vector.shape_cast %45 : vector<16x16xf32> to vector<16x2x8xf32>
      %79 = tpu.transpose %78, [1, 0, 2] : vector<16x2x8xf32> -> vector<2x16x8xf32>
      %80 = arith.truncf %79 : vector<2x16x8xf32> to vector<2x16x8xbf16>
      %c0_41 = arith.constant 0 : index
      %c0_42 = arith.constant 0 : index
      %81 = vector.load %arg6[%c0_41, %c0_42] : memref<32x32xbf16, #tpu.memory_space<vmem>>, vector<32x32xbf16>
      %c0_43 = arith.constant 0 : index
      %c0_44 = arith.constant 0 : index
      %82 = vector.load %arg11[%c0_43, %c0_44] : memref<1x32xf32, #tpu.memory_space<vmem>>, vector<1x32xf32>
      %83 = tpu.iota {dimensions = array<i32: 0>} : vector<8x8xi32>
      %84 = tpu.concatenate %83, %83 in 0 : vector<8x8xi32>, vector<8x8xi32> -> vector<16x8xi32>
      %85 = tpu.iota {dimensions = array<i32: 1>} : vector<8x8xi32>
      %86 = tpu.concatenate %85, %85 in 0 : vector<8x8xi32>, vector<8x8xi32> -> vector<16x8xi32>
      %87 = arith.cmpi sle, %86, %84 : vector<16x8xi32>
      %88 = vector.shape_cast %87 : vector<16x8xi1> to vector<1x16x8xi1>
      %89 = vector.extract_strided_slice %64 {offsets = [0, 0, 0], sizes = [4, 8, 8], strides = [1, 1, 1]} : vector<4x16x8xbf16> to vector<4x8x8xbf16>
      %90 = vector.shape_cast %89 : vector<4x8x8xbf16> to vector<2x16x8xbf16>
      %cst_45 = arith.constant -1.000000e+30 : f32
      %91 = vector.broadcast %cst_45 : f32 to vector<2x16x1xf32>
      %cst_46 = arith.constant 0.000000e+00 : f32
      %92 = vector.broadcast %cst_46 : f32 to vector<2x16x1xf32>
      %cst_47 = arith.constant 0.000000e+00 : f32
      %93 = vector.broadcast %cst_47 : f32 to vector<2x16x8xf32>
      %94 = vector.extract_strided_slice %77 {offsets = [0, 0, 0], sizes = [2, 8, 8], strides = [1, 1, 1]} : vector<2x16x8xbf16> to vector<2x8x8xbf16>
      %95 = vector.extract_strided_slice %80 {offsets = [0, 0, 0], sizes = [2, 8, 8], strides = [1, 1, 1]} : vector<2x16x8xbf16> to vector<2x8x8xbf16>
      "tpu.trace_start"() <{level = 10 : i32, message = "gqd,gkd->gqk"}> : () -> ()
      %cst_48 = arith.constant dense<0.000000e+00> : vector<2x16x8xf32>
      %96 = tpu.matmul %90, %94, %cst_48 {dimension_numbers = #tpu.dot_dimension_numbers<[2], [2], [1], [1], [0, 0, 0, 1, 1, 1], [0], [0]>} : vector<2x16x8xbf16>, vector<2x8x8xbf16>, vector<2x16x8xf32> -> vector<2x16x8xf32>
      %cst_49 = arith.constant -1.000000e+30 : f32
      "tpu.trace_stop"() : () -> ()
      %97 = vector.shape_cast %88 : vector<1x16x8xi1> to vector<1x16x8xi1>
      %98 = vector.broadcast %97 : vector<1x16x8xi1> to vector<2x16x8xi1>
      %99 = vector.broadcast %cst_49 : f32 to vector<2x16x8xf32>
      %100 = arith.select %98, %96, %99 : vector<2x16x8xi1>, vector<2x16x8xf32>
      %cst_50 = arith.constant dense<0xFF800000> : vector<2x16xf32>
      %101 = vector.multi_reduction <maximumf>, %100, %cst_50 [2] : vector<2x16x8xf32> to vector<2x16xf32>
      %102 = vector.shape_cast %101 : vector<2x16xf32> to vector<2x16x1xf32>
      %103 = arith.maximumf %91, %102 : vector<2x16x1xf32>
      %104 = arith.subf %91, %103 : vector<2x16x1xf32>
      %105 = math.exp %104 : vector<2x16x1xf32>
      %106 = vector.broadcast %103 : vector<2x16x1xf32> to vector<2x16x8xf32>
      %107 = arith.subf %100, %106 : vector<2x16x8xf32>
      %108 = math.exp %107 : vector<2x16x8xf32>
      %109 = arith.mulf %105, %92 : vector<2x16x1xf32>
      %cst_51 = arith.constant dense<0.000000e+00> : vector<2x16xf32>
      %110 = vector.multi_reduction <add>, %108, %cst_51 [2] : vector<2x16x8xf32> to vector<2x16xf32>
      %111 = vector.shape_cast %110 : vector<2x16xf32> to vector<2x16x1xf32>
      %112 = arith.addf %109, %111 : vector<2x16x1xf32>
      %113 = vector.broadcast %105 : vector<2x16x1xf32> to vector<2x16x8xf32>
      %114 = arith.mulf %113, %93 : vector<2x16x8xf32>
      %115 = arith.truncf %108 : vector<2x16x8xf32> to vector<2x16x8xbf16>
      "tpu.trace_start"() <{level = 10 : i32, message = "gqk,gkd->gqd"}> : () -> ()
      %cst_52 = arith.constant dense<0.000000e+00> : vector<2x16x8xf32>
      %116 = tpu.matmul %115, %95, %cst_52 {dimension_numbers = #tpu.dot_dimension_numbers<[2], [1], [1], [2], [0, 0, 0, 1, 1, 2], [0], [0]>} : vector<2x16x8xbf16>, vector<2x8x8xbf16>, vector<2x16x8xf32> -> vector<2x16x8xf32>
      "tpu.trace_stop"() : () -> ()
      %117 = arith.addf %114, %116 : vector<2x16x8xf32>
      %118 = tpu.reciprocal %112 {approx = true} : vector<2x16x1xf32> -> vector<2x16x1xf32>
      %119 = vector.broadcast %118 : vector<2x16x1xf32> to vector<2x16x8xf32>
      %120 = arith.mulf %117, %119 : vector<2x16x8xf32>
      %121 = vector.shape_cast %120 : vector<2x16x8xf32> to vector<4x8x8xf32>
      %122 = tpu.transpose %121, [1, 0, 2] : vector<4x8x8xf32> -> vector<8x4x8xf32>
      %123 = vector.shape_cast %122 : vector<8x4x8xf32> to vector<8x32xf32>
      %124 = arith.truncf %123 : vector<8x32xf32> to vector<8x32xbf16>
      %cst_53 = arith.constant dense<0.000000e+00> : vector<8x32xf32>
      %125 = tpu.matmul %124, %81, %cst_53 {dimension_numbers = #tpu.dot_dimension_numbers<[1], [0], [0], [1], [0, 0, 1, 1], [], []>} : vector<8x32xbf16>, vector<32x32xbf16>, vector<8x32xf32> -> vector<8x32xf32>
      %126 = vector.extract_strided_slice %25 {offsets = [0, 0], sizes = [8, 32], strides = [1, 1]} : vector<16x32xf32> to vector<8x32xf32>
      %127 = arith.addf %126, %125 : vector<8x32xf32>
      %c0_54 = arith.constant 0 : index
      %c0_55 = arith.constant 0 : index
      %c0_56 = arith.constant 0 : index
      %128 = vector.load %arg14[%c0_54, %c0_55, %c0_56] : memref<1x16x32xf32, #tpu.memory_space<vmem>>, vector<1x8x32xf32>
      %129 = vector.shape_cast %128 : vector<1x8x32xf32> to vector<8x32xf32>
      %130 = vector.shape_cast %127 : vector<8x32xf32> to vector<1x8x32xf32>
      tpu.vector_store %arg14[%c0_54, %c0_55, %c0_56], %130 {strides = array<i32>} : memref<1x16x32xf32, #tpu.memory_space<vmem>>, vector<1x8x32xf32>,
      %131 = arith.mulf %127, %127 : vector<8x32xf32>
      %cst_57 = arith.constant dense<0.000000e+00> : vector<8xf32>
      %132 = vector.multi_reduction <add>, %131, %cst_57 [1] : vector<8x32xf32> to vector<8xf32>
      %133 = vector.shape_cast %132 : vector<8xf32> to vector<8x1xf32>
      %cst_58 = arith.constant 3.200000e+01 : f32
      %134 = vector.broadcast %cst_58 : f32 to vector<8x1xf32>
      %135 = arith.divf %133, %134 : vector<8x1xf32>
      %cst_59 = arith.constant 9.99999997E-7 : f32
      %136 = vector.broadcast %cst_59 : f32 to vector<8x1xf32>
      %137 = arith.addf %135, %136 : vector<8x1xf32>
      %138 = math.rsqrt %137 : vector<8x1xf32>
      %139 = vector.broadcast %138 : vector<8x1xf32> to vector<8x32xf32>
      %140 = arith.mulf %127, %139 : vector<8x32xf32>
      %141 = vector.broadcast %82 : vector<1x32xf32> to vector<8x32xf32>
      %142 = arith.mulf %140, %141 : vector<8x32xf32>
      %143 = arith.truncf %142 : vector<8x32xf32> to vector<8x32xbf16>
      %c0_60 = arith.constant 0 : index
      %c0_61 = arith.constant 0 : index
      %144 = vector.load %arg15[%c0_60, %c0_61] : memref<16x32xbf16, #tpu.memory_space<vmem>>, vector<8x32xbf16>
      tpu.vector_store %arg15[%c0_60, %c0_61], %143 {strides = array<i32>} : memref<16x32xbf16, #tpu.memory_space<vmem>>, vector<8x32xbf16>,
      %145 = vector.extract_strided_slice %64 {offsets = [0, 8, 0], sizes = [4, 8, 8], strides = [1, 1, 1]} : vector<4x16x8xbf16> to vector<4x8x8xbf16>
      %146 = vector.shape_cast %145 : vector<4x8x8xbf16> to vector<2x16x8xbf16>
      %cst_62 = arith.constant -1.000000e+30 : f32
      %147 = vector.broadcast %cst_62 : f32 to vector<2x16x1xf32>
      %cst_63 = arith.constant 0.000000e+00 : f32
      %148 = vector.broadcast %cst_63 : f32 to vector<2x16x1xf32>
      %cst_64 = arith.constant 0.000000e+00 : f32
      %149 = vector.broadcast %cst_64 : f32 to vector<2x16x8xf32>
      %150 = vector.extract_strided_slice %77 {offsets = [0, 0, 0], sizes = [2, 8, 8], strides = [1, 1, 1]} : vector<2x16x8xbf16> to vector<2x8x8xbf16>
      %151 = vector.extract_strided_slice %80 {offsets = [0, 0, 0], sizes = [2, 8, 8], strides = [1, 1, 1]} : vector<2x16x8xbf16> to vector<2x8x8xbf16>
      "tpu.trace_start"() <{level = 10 : i32, message = "gqd,gkd->gqk"}> : () -> ()
      %cst_65 = arith.constant dense<0.000000e+00> : vector<2x16x8xf32>
      %152 = tpu.matmul %146, %150, %cst_65 {dimension_numbers = #tpu.dot_dimension_numbers<[2], [2], [1], [1], [0, 0, 0, 1, 1, 1], [0], [0]>} : vector<2x16x8xbf16>, vector<2x8x8xbf16>, vector<2x16x8xf32> -> vector<2x16x8xf32>
      "tpu.trace_stop"() : () -> ()
      %cst_66 = arith.constant dense<0xFF800000> : vector<2x16xf32>
      %153 = vector.multi_reduction <maximumf>, %152, %cst_66 [2] : vector<2x16x8xf32> to vector<2x16xf32>
      %154 = vector.shape_cast %153 : vector<2x16xf32> to vector<2x16x1xf32>
      %155 = arith.maximumf %147, %154 : vector<2x16x1xf32>
      %156 = arith.subf %147, %155 : vector<2x16x1xf32>
      %157 = math.exp %156 : vector<2x16x1xf32>
      %158 = vector.broadcast %155 : vector<2x16x1xf32> to vector<2x16x8xf32>
      %159 = arith.subf %152, %158 : vector<2x16x8xf32>
      %160 = math.exp %159 : vector<2x16x8xf32>
      %161 = arith.mulf %157, %148 : vector<2x16x1xf32>
      %cst_67 = arith.constant dense<0.000000e+00> : vector<2x16xf32>
      %162 = vector.multi_reduction <add>, %160, %cst_67 [2] : vector<2x16x8xf32> to vector<2x16xf32>
      %163 = vector.shape_cast %162 : vector<2x16xf32> to vector<2x16x1xf32>
      %164 = arith.addf %161, %163 : vector<2x16x1xf32>
      %165 = vector.broadcast %157 : vector<2x16x1xf32> to vector<2x16x8xf32>
      %166 = arith.mulf %165, %149 : vector<2x16x8xf32>
      %167 = arith.truncf %160 : vector<2x16x8xf32> to vector<2x16x8xbf16>
      "tpu.trace_start"() <{level = 10 : i32, message = "gqk,gkd->gqd"}> : () -> ()
      %cst_68 = arith.constant dense<0.000000e+00> : vector<2x16x8xf32>
      %168 = tpu.matmul %167, %151, %cst_68 {dimension_numbers = #tpu.dot_dimension_numbers<[2], [1], [1], [2], [0, 0, 0, 1, 1, 2], [0], [0]>} : vector<2x16x8xbf16>, vector<2x8x8xbf16>, vector<2x16x8xf32> -> vector<2x16x8xf32>
      "tpu.trace_stop"() : () -> ()
      %169 = arith.addf %166, %168 : vector<2x16x8xf32>
      %170 = vector.extract_strided_slice %77 {offsets = [0, 8, 0], sizes = [2, 8, 8], strides = [1, 1, 1]} : vector<2x16x8xbf16> to vector<2x8x8xbf16>
      %171 = vector.extract_strided_slice %80 {offsets = [0, 8, 0], sizes = [2, 8, 8], strides = [1, 1, 1]} : vector<2x16x8xbf16> to vector<2x8x8xbf16>
      "tpu.trace_start"() <{level = 10 : i32, message = "gqd,gkd->gqk"}> : () -> ()
      %cst_69 = arith.constant dense<0.000000e+00> : vector<2x16x8xf32>
      %172 = tpu.matmul %146, %170, %cst_69 {dimension_numbers = #tpu.dot_dimension_numbers<[2], [2], [1], [1], [0, 0, 0, 1, 1, 1], [0], [0]>} : vector<2x16x8xbf16>, vector<2x8x8xbf16>, vector<2x16x8xf32> -> vector<2x16x8xf32>
      %cst_70 = arith.constant -1.000000e+30 : f32
      "tpu.trace_stop"() : () -> ()
      %173 = vector.shape_cast %88 : vector<1x16x8xi1> to vector<1x16x8xi1>
      %174 = vector.broadcast %173 : vector<1x16x8xi1> to vector<2x16x8xi1>
      %175 = vector.broadcast %cst_70 : f32 to vector<2x16x8xf32>
      %176 = arith.select %174, %172, %175 : vector<2x16x8xi1>, vector<2x16x8xf32>
      %cst_71 = arith.constant dense<0xFF800000> : vector<2x16xf32>
      %177 = vector.multi_reduction <maximumf>, %176, %cst_71 [2] : vector<2x16x8xf32> to vector<2x16xf32>
      %178 = vector.shape_cast %177 : vector<2x16xf32> to vector<2x16x1xf32>
      %179 = arith.maximumf %155, %178 : vector<2x16x1xf32>
      %180 = arith.subf %155, %179 : vector<2x16x1xf32>
      %181 = math.exp %180 : vector<2x16x1xf32>
      %182 = vector.broadcast %179 : vector<2x16x1xf32> to vector<2x16x8xf32>
      %183 = arith.subf %176, %182 : vector<2x16x8xf32>
      %184 = math.exp %183 : vector<2x16x8xf32>
      %185 = arith.mulf %181, %164 : vector<2x16x1xf32>
      %cst_72 = arith.constant dense<0.000000e+00> : vector<2x16xf32>
      %186 = vector.multi_reduction <add>, %184, %cst_72 [2] : vector<2x16x8xf32> to vector<2x16xf32>
      %187 = vector.shape_cast %186 : vector<2x16xf32> to vector<2x16x1xf32>
      %188 = arith.addf %185, %187 : vector<2x16x1xf32>
      %189 = vector.broadcast %181 : vector<2x16x1xf32> to vector<2x16x8xf32>
      %190 = arith.mulf %189, %169 : vector<2x16x8xf32>
      %191 = arith.truncf %184 : vector<2x16x8xf32> to vector<2x16x8xbf16>
      "tpu.trace_start"() <{level = 10 : i32, message = "gqk,gkd->gqd"}> : () -> ()
      %cst_73 = arith.constant dense<0.000000e+00> : vector<2x16x8xf32>
      %192 = tpu.matmul %191, %171, %cst_73 {dimension_numbers = #tpu.dot_dimension_numbers<[2], [1], [1], [2], [0, 0, 0, 1, 1, 2], [0], [0]>} : vector<2x16x8xbf16>, vector<2x8x8xbf16>, vector<2x16x8xf32> -> vector<2x16x8xf32>
      "tpu.trace_stop"() : () -> ()
      %193 = arith.addf %190, %192 : vector<2x16x8xf32>
      %194 = tpu.reciprocal %188 {approx = true} : vector<2x16x1xf32> -> vector<2x16x1xf32>
      %195 = vector.broadcast %194 : vector<2x16x1xf32> to vector<2x16x8xf32>
      %196 = arith.mulf %193, %195 : vector<2x16x8xf32>
      %197 = vector.shape_cast %196 : vector<2x16x8xf32> to vector<4x8x8xf32>
      %198 = tpu.transpose %197, [1, 0, 2] : vector<4x8x8xf32> -> vector<8x4x8xf32>
      %199 = vector.shape_cast %198 : vector<8x4x8xf32> to vector<8x32xf32>
      %200 = arith.truncf %199 : vector<8x32xf32> to vector<8x32xbf16>
      %cst_74 = arith.constant dense<0.000000e+00> : vector<8x32xf32>
      %201 = tpu.matmul %200, %81, %cst_74 {dimension_numbers = #tpu.dot_dimension_numbers<[1], [0], [0], [1], [0, 0, 1, 1], [], []>} : vector<8x32xbf16>, vector<32x32xbf16>, vector<8x32xf32> -> vector<8x32xf32>
      %202 = vector.extract_strided_slice %25 {offsets = [8, 0], sizes = [8, 32], strides = [1, 1]} : vector<16x32xf32> to vector<8x32xf32>
      %203 = arith.addf %202, %201 : vector<8x32xf32>
      %c0_75 = arith.constant 0 : index
      %c8 = arith.constant 8 : index
      %c0_76 = arith.constant 0 : index
      %204 = vector.load %arg14[%c0_75, %c8, %c0_76] : memref<1x16x32xf32, #tpu.memory_space<vmem>>, vector<1x8x32xf32>
      %205 = vector.shape_cast %204 : vector<1x8x32xf32> to vector<8x32xf32>
      %206 = vector.shape_cast %203 : vector<8x32xf32> to vector<1x8x32xf32>
      tpu.vector_store %arg14[%c0_75, %c8, %c0_76], %206 {strides = array<i32>} : memref<1x16x32xf32, #tpu.memory_space<vmem>>, vector<1x8x32xf32>,
      %207 = arith.mulf %203, %203 : vector<8x32xf32>
      %cst_77 = arith.constant dense<0.000000e+00> : vector<8xf32>
      %208 = vector.multi_reduction <add>, %207, %cst_77 [1] : vector<8x32xf32> to vector<8xf32>
      %209 = vector.shape_cast %208 : vector<8xf32> to vector<8x1xf32>
      %cst_78 = arith.constant 3.200000e+01 : f32
      %210 = vector.broadcast %cst_78 : f32 to vector<8x1xf32>
      %211 = arith.divf %209, %210 : vector<8x1xf32>
      %cst_79 = arith.constant 9.99999997E-7 : f32
      %212 = vector.broadcast %cst_79 : f32 to vector<8x1xf32>
      %213 = arith.addf %211, %212 : vector<8x1xf32>
      %214 = math.rsqrt %213 : vector<8x1xf32>
      %215 = vector.broadcast %214 : vector<8x1xf32> to vector<8x32xf32>
      %216 = arith.mulf %203, %215 : vector<8x32xf32>
      %217 = vector.broadcast %82 : vector<1x32xf32> to vector<8x32xf32>
      %218 = arith.mulf %216, %217 : vector<8x32xf32>
      %219 = arith.truncf %218 : vector<8x32xf32> to vector<8x32xbf16>
      %c8_80 = arith.constant 8 : index
      %c0_81 = arith.constant 0 : index
      %220 = vector.load %arg15[%c8_80, %c0_81] : memref<16x32xbf16, #tpu.memory_space<vmem>>, vector<8x32xbf16>
      tpu.vector_store %arg15[%c8_80, %c0_81], %219 {strides = array<i32>} : memref<16x32xbf16, #tpu.memory_space<vmem>>, vector<8x32xbf16>,
    } else {
    }
    %c0 = arith.constant 0 : index
    %c0_1 = arith.constant 0 : index
    %3 = vector.load %arg15[%c0, %c0_1] : memref<16x32xbf16, #tpu.memory_space<vmem>>, vector<16x32xbf16>
    %c0_2 = arith.constant 0 : index
    %c0_3 = arith.constant 0 : index
    %4 = vector.load %arg7[%c0_2, %c0_3] : memref<32x128xbf16, #tpu.memory_space<vmem>>, vector<32x128xbf16>
    %cst = arith.constant dense<0.000000e+00> : vector<16x128xf32>
    %5 = tpu.matmul %3, %4, %cst {dimension_numbers = #tpu.dot_dimension_numbers<[1], [0], [0], [1], [0, 0, 1, 1], [], []>} : vector<16x32xbf16>, vector<32x128xbf16>, vector<16x128xf32> -> vector<16x128xf32>
    %c0_4 = arith.constant 0 : index
    %c0_5 = arith.constant 0 : index
    %6 = vector.load %arg9[%c0_4, %c0_5] : memref<32x128xbf16, #tpu.memory_space<vmem>>, vector<32x128xbf16>
    %cst_6 = arith.constant dense<0.000000e+00> : vector<16x128xf32>
    %7 = tpu.matmul %3, %6, %cst_6 {dimension_numbers = #tpu.dot_dimension_numbers<[1], [0], [0], [1], [0, 0, 1, 1], [], []>} : vector<16x32xbf16>, vector<32x128xbf16>, vector<16x128xf32> -> vector<16x128xf32>
    %8 = arith.negf %5 : vector<16x128xf32>
    %9 = math.exp %8 : vector<16x128xf32>
    %cst_7 = arith.constant 1.000000e+00 : f32
    %10 = vector.broadcast %cst_7 : f32 to vector<16x128xf32>
    %11 = arith.addf %10, %9 : vector<16x128xf32>
    %12 = arith.divf %10, %11 : vector<16x128xf32>
    %13 = arith.mulf %5, %12 : vector<16x128xf32>
    %14 = arith.mulf %13, %7 : vector<16x128xf32>
    %15 = arith.truncf %14 : vector<16x128xf32> to vector<16x128xbf16>
    %c0_8 = arith.constant 0 : index
    %c0_9 = arith.constant 0 : index
    %c0_10 = arith.constant 0 : index
    %16 = vector.load %arg14[%c0_8, %c0_9, %c0_10] : memref<1x16x32xf32, #tpu.memory_space<vmem>>, vector<1x16x32xf32>
    %17 = vector.shape_cast %16 : vector<1x16x32xf32> to vector<16x32xf32>
    %c0_11 = arith.constant 0 : index
    %c0_12 = arith.constant 0 : index
    %18 = vector.load %arg8[%c0_11, %c0_12] : memref<128x32xbf16, #tpu.memory_space<vmem>>, vector<128x32xbf16>
    %cst_13 = arith.constant dense<0.000000e+00> : vector<16x32xf32>
    %19 = tpu.matmul %15, %18, %cst_13 {dimension_numbers = #tpu.dot_dimension_numbers<[1], [0], [0], [1], [0, 0, 1, 1], [], []>} : vector<16x128xbf16>, vector<128x32xbf16>, vector<16x32xf32> -> vector<16x32xf32>
    %20 = arith.addf %17, %19 : vector<16x32xf32>
    %c0_14 = arith.constant 0 : index
    %c0_15 = arith.constant 0 : index
    %c0_16 = arith.constant 0 : index
    %21 = vector.load %arg14[%c0_14, %c0_15, %c0_16] : memref<1x16x32xf32, #tpu.memory_space<vmem>>, vector<1x16x32xf32>
    %22 = vector.shape_cast %21 : vector<1x16x32xf32> to vector<16x32xf32>
    %23 = vector.shape_cast %20 : vector<16x32xf32> to vector<1x16x32xf32>
    tpu.vector_store %arg14[%c0_14, %c0_15, %c0_16], %23 {strides = array<i32>} : memref<1x16x32xf32, #tpu.memory_space<vmem>>, vector<1x16x32xf32>,
    return
  }
  func.func @transform_0(%arg0: i32, %arg1: i32) -> (i32, i32, i32) {
    %c0_i32 = arith.constant 0 : i32
    %c0_i32_0 = arith.constant 0 : i32
    %c0_i32_1 = arith.constant 0 : i32
    return %arg0, %c0_i32, %c0_i32_0 : i32, i32, i32
  }
  func.func @transform_1(%arg0: i32, %arg1: i32) -> (i32, i32) {
    %c0_i32 = arith.constant 0 : i32
    %c0_i32_0 = arith.constant 0 : i32
    %c0_i32_1 = arith.constant 0 : i32
    return %c0_i32, %c0_i32_0 : i32, i32
  }
  func.func @transform_2(%arg0: i32, %arg1: i32) -> (i32, i32) {
    %c0_i32 = arith.constant 0 : i32
    %c0_i32_0 = arith.constant 0 : i32
    %c0_i32_1 = arith.constant 0 : i32
    return %c0_i32, %c0_i32_0 : i32, i32
  }
  func.func @transform_3(%arg0: i32, %arg1: i32) -> (i32, i32) {
    %c0_i32 = arith.constant 0 : i32
    %c0_i32_0 = arith.constant 0 : i32
    %c0_i32_1 = arith.constant 0 : i32
    return %c0_i32, %c0_i32_0 : i32, i32
  }
  func.func @transform_4(%arg0: i32, %arg1: i32) -> (i32, i32) {
    %c0_i32 = arith.constant 0 : i32
    %c0_i32_0 = arith.constant 0 : i32
    %c0_i32_1 = arith.constant 0 : i32
    return %c0_i32, %c0_i32_0 : i32, i32
  }
  func.func @transform_5(%arg0: i32, %arg1: i32) -> (i32, i32) {
    %c0_i32 = arith.constant 0 : i32
    %c0_i32_0 = arith.constant 0 : i32
    return %c0_i32, %arg1 : i32, i32
  }
  func.func @transform_6(%arg0: i32, %arg1: i32) -> (i32, i32) {
    %c0_i32 = arith.constant 0 : i32
    %c0_i32_0 = arith.constant 0 : i32
    return %arg1, %c0_i32 : i32, i32
  }
  func.func @transform_7(%arg0: i32, %arg1: i32) -> (i32, i32) {
    %c0_i32 = arith.constant 0 : i32
    %c0_i32_0 = arith.constant 0 : i32
    return %c0_i32, %arg1 : i32, i32
  }
  func.func @transform_8(%arg0: i32, %arg1: i32) -> (i32, i32) {
    %c0_i32 = arith.constant 0 : i32
    %c0_i32_0 = arith.constant 0 : i32
    %c0_i32_1 = arith.constant 0 : i32
    return %c0_i32, %c0_i32_0 : i32, i32
  }
  func.func @transform_9(%arg0: i32, %arg1: i32) -> (i32, i32) {
    %c0_i32 = arith.constant 0 : i32
    %c0_i32_0 = arith.constant 0 : i32
    %c0_i32_1 = arith.constant 0 : i32
    return %c0_i32, %c0_i32_0 : i32, i32
  }
  func.func @transform_10(%arg0: i32, %arg1: i32) -> (i32, i32) {
    %c0_i32 = arith.constant 0 : i32
    %c0_i32_0 = arith.constant 0 : i32
    %c0_i32_1 = arith.constant 0 : i32
    return %c0_i32, %c0_i32_0 : i32, i32
  }
  func.func @transform_11(%arg0: i32, %arg1: i32) -> (i32, i32) {
    %c0_i32 = arith.constant 0 : i32
    %c0_i32_0 = arith.constant 0 : i32
    %c0_i32_1 = arith.constant 0 : i32
    return %c0_i32, %c0_i32_0 : i32, i32
  }
  func.func @transform_12(%arg0: i32, %arg1: i32) -> (i32, i32, i32) {
    %c0_i32 = arith.constant 0 : i32
    %c0_i32_0 = arith.constant 0 : i32
    %c0_i32_1 = arith.constant 0 : i32
    return %arg0, %c0_i32, %c0_i32_0 : i32, i32, i32
  }
}

</mosaic_0001>

<bundles_post_ra>
// kernel: tpu_custom_call.1
= control target key start
LH: loop header
LB: loop body
LE: loop exit
PB: predicated region body
PF: predicated region fallthrough
CT: control target
= control target key end

     0   :  { %s4929_s0 = inlined_call_operand.vmem [shape: f32[2,16,32], index: 0, kind: input, shape index: {}]   ;;  %s4930_s1 = inlined_call_operand.vmem [shape: bf16[32,32], index: 1, kind: input, shape index: {}]   ;;  %s4931_s2 = inlined_call_operand.vmem [shape: bf16[32,16], index: 2, kind: input, shape index: {}]   ;;  %s4932_s3 = inlined_call_operand.vmem [shape: bf16[32,16], index: 3, kind: input, shape index: {}]   ;;  %s4933_s4 = inlined_call_operand.vmem [shape: bf16[32,32], index: 4, kind: input, shape index: {}]   ;;  %s4934_s5 = inlined_call_operand.vmem [shape: bf16[32,256], index: 5, kind: input, shape index: {}]   ;;  %s4935_s6 = inlined_call_operand.vmem [shape: bf16[256,32], index: 6, kind: input, shape index: {}]   ;;  %s4936_s7 = inlined_call_operand.vmem [shape: bf16[32,256], index: 7, kind: input, shape index: {}]   ;;  %s4937_s8 = inlined_call_operand.vmem [shape: f32[1,32], index: 8, kind: input, shape index: {}]   ;;  %s4938_s9 = inlined_call_operand.vmem [shape: f32[1,32], index: 9, kind: input, shape index: {}]   ;;  %s4939_s10 = inlined_call_operand.vmem [shape: f32[16,8], index: 10, kind: input, shape index: {}]   ;;  %s4940_s11 = inlined_call_operand.vmem [shape: f32[16,8], index: 11, kind: input, shape index: {}]   ;;  %s4941_s12 = inlined_call_operand.hbm [shape: f32[2,16,32], index: 12, kind: output, shape index: {}]  }
   0x1   :  { %4952 = sst [smem:[#allocation15_spill]] %s4933_s4 }
   0x2   :  { %4953 = sst [smem:[#allocation16_spill]] %s4934_s5 }
   0x3   :  { %4954 = sst [smem:[#allocation17_spill]] %s4936_s7 }
   0x4   :  { %4955 = sst [smem:[#allocation18_spill]] %s4938_s9 }
   0x5   :  { %4956 = sst [smem:[#allocation19_spill]] %s4941_s12 }
   0x6   :  { %17 = vsyncpa [#allocation6], 0 }
   0x7   :  { %19 = vsyncpa [#allocation6 + $0x1], 0  ;;  %s4075_s21 = smov 0   ;;  %s4077_s22 = smov 0  }
   0x8   :  { %s4079_s23 = smov 0   ;;  %s4081_s24 = smov 0  }
   0x9   :  { %s4083_s25 = smov 0   ;;  %s4085_s26 = smov 0  }
   0xa   :  { %s4087_s27 = smov 0   ;;  %s4089_s28 = smov 0  }
   0xb   :  { %s4091_s29 = smov 0   ;;  %s4093_s30 = smov 0  }
   0xc LB: > { %4957 = sst [smem:[#allocation8_spill]] %s3971_s25  ;;  %s3383_s13 = sadd.s32 4294967295, %s3991_s30   ;;  %s3991_s30 = sphi %s4093_s30, %s25_s30   ;;  %s3987_s29 = sphi %s4091_s29, %s4986_s29   ;;  %s3983_s28 = sphi %s4089_s28, %s4985_s28   ;;  %s3979_s27 = sphi %s4087_s27, %s4984_s27   ;;  %s3975_s26 = sphi %s4085_s26, %s4990_s26   ;;  %s3971_s25 = sphi %s4083_s25, %s4982_s25   ;;  %s3967_s24 = sphi %s4081_s24, %s4981_s24   ;;  %s3963_s23 = sphi %s4079_s23, %s4989_s23   ;;  %s3959_s22 = sphi %s4077_s22, %s4988_s22   ;;  %s3955_s21 = sphi %s4075_s21, %s4987_s21  }
   0xd   : > { %4958 = sst [smem:[#allocation9_spill]] %s3983_s28  ;;  %s3384_s14 = sadd.s32 4294967294, %s3991_s30  }
   0xe   : > { %4959 = sst [smem:[#allocation10_spill]] %s3987_s29  ;;  %s34_s15 = sadd.s32 1, %s3983_s28 }
   0xf   : > { %s37_s16 = sadd.s32 1, %s3987_s29  ;;  %p35_p0 = scmp.ge.s32.totalorder %s34_s15, 2 }
  0x10   : > { %s154_s17 = sadd.s32 1, %s3971_s25  ;;  %p161_p1 = scmp.ne.s32.totalorder %s3971_s25, %s3967_s24 }
  0x11   : > { %p162_p2 = scmp.eq.s32.totalorder %s3991_s30, 0  ;;  %s4992_s15 = smov (%p35_p0, %s34_s15), 0 }
  0x12   : > { %4960 = sst [smem:[#allocation11_spill]] %s4992_s15  ;;  %s4994_s16 = smov (!%p35_p0, %s37_s16), %s3987_s29 }
  0x13   : > { %s151_s18 = ssub.s32 %s3983_s28, %s4992_s15  ;;  %p4138_p3 = por %p162_p2, %p161_p1 }
  0x14   : > { %p39_p4 = scmp.ge.s32.totalorder %s4994_s16, 2  ;;  %p152_p5 = scmp.eq.s32.totalorder %s151_s18, 0 }
  0x15   : > { %s316_s20 = sadd.s32 1, %s3963_s23  ;;  %p326_p6 = scmp.ne.s32.totalorder %s3963_s23, %s3959_s22 }
  0x16   : > { %s4996_s16 = smov (%p39_p4, %s4994_s16), 0  ;;  %p327_p7 = scmp.eq.s32.totalorder %s3383_s13, 3 }
  0x17   : > { %4962 = sst [smem:[#allocation12_spill]] %s4996_s16  ;;  %s313_s9 = ssub.s32 %s3987_s29, %s4996_s16 }
  0x18   : > { %s4148_s12 = scalar_select %p152_p5, %s3971_s25, %s154_s17  }
  0x19   : > { %p314_p8 = scmp.eq.s32.totalorder %s313_s9, 0  ;;  %p332_p9 = scmp.ne.s32.totalorder %s3959_s22, %s3955_s21 }
  0x1a   : > { %4963 = sst [smem:[#allocation13_spill]] %s4148_s12  ;;  %p4154_p10 = por %p327_p7, %p326_p6 }
  0x1b   : > { %p333_p11 = scmp.eq.s32.totalorder %s3384_s14, 3  ;;  %p3386_p13 = scmp.ge.s32.totalorder %s3991_s30, 4 }
  0x1c   : > { %s4159_s15 = scalar_select %p314_p8, %s3963_s23, %s316_s20  }
  0x1d   : > { %p4161_p12 = por %p333_p11, %p332_p9  ;;  %373 = sbr.rel (%p3386_p13) target bundleno = 60 (0x3c), region = 48 }
  0x1e   : > { %4965 = sst [smem:[#allocation14_spill]] %s4159_s15 }
  0x24   : > { %384 = sbr.rel (!%p4138_p3) target bundleno = 48 (0x30), region = 56  ;;  %s386_s9 = sand.u32 (%p4138_p3), 1, %s3971_s25  }
  0x25   : > { %s3388_s13 = sshll.u32 (%p4138_p3), %s3983_s28, 2  ;;  %s3387_s17 = sshll.u32 (%p4138_p3), %s386_s9, 4 }
  0x26   : > { %s4967_s5 = sld [smem:[#allocation16_spill]] (%p4138_p3)  ;;  %s388_s20 = scalar_lea.vmem (%p4138_p3), [#allocation3], %s3387_s17 }
  0x2c   : > { %s390_s14 = scalar_lea.vmem %s4967_s5, %s3388_s13 }
  0x2d   : > { %v406_v0 = vld [vmem:[%s390_s14] sm:$0xf]  ;;  %v408_v1 = vld [vmem:[%s390_s14 + $0x8] sm:$0xf]  ;;  %v410_v2 = vld [vmem:[%s390_s14 + $0x10] sm:$0xf] }
  0x2e   : > { %407 = vst [vmem:[%s388_s20] sm:$0xf] %v406_v0  ;;  %409 = vst [vmem:[%s388_s20 + $0x4] sm:$0xf] %v408_v1  ;;  %v412_v3 = vld [vmem:[%s390_s14 + $0x18] sm:$0xf] }
  0x2f   : > { %411 = vst [vmem:[%s388_s20 + $0x8] sm:$0xf] %v410_v2  ;;  %413 = vst [vmem:[%s388_s20 + $0xc] sm:$0xf] %v412_v3 }
  0x30 PF: > { %453 = sbr.rel (!%p4138_p3) target bundleno = 60 (0x3c), region = 101  ;;  %s455_s9 = sand.u32 (%p4138_p3), 1, %s3971_s25  }
  0x31   : > { %s3390_s12 = sshll.u32 (%p4138_p3), %s3983_s28, 2  ;;  %s3389_s15 = sshll.u32 (%p4138_p3), %s455_s9, 4 }
  0x32   : > { %s4968_s7 = sld [smem:[#allocation17_spill]] (%p4138_p3)  ;;  %s457_s17 = scalar_lea.vmem (%p4138_p3), [#allocation4], %s3389_s15 }
  0x38   : > { %s459_s13 = scalar_lea.vmem %s4968_s7, %s3390_s12 }
  0x39   : > { %v475_v4 = vld [vmem:[%s459_s13] sm:$0xf]  ;;  %v477_v5 = vld [vmem:[%s459_s13 + $0x8] sm:$0xf]  ;;  %v479_v6 = vld [vmem:[%s459_s13 + $0x10] sm:$0xf] }
  0x3a   : > { %476 = vst [vmem:[%s457_s17] sm:$0xf] %v475_v4  ;;  %478 = vst [vmem:[%s457_s17 + $0x4] sm:$0xf] %v477_v5  ;;  %v481_v7 = vld [vmem:[%s459_s13 + $0x18] sm:$0xf] }
  0x3b   : > { %480 = vst [vmem:[%s457_s17 + $0x8] sm:$0xf] %v479_v6  ;;  %482 = vst [vmem:[%s457_s17 + $0xc] sm:$0xf] %v481_v7 }
  0x3c PF: > { %p3391_p0 = scmp.ge.s32.totalorder %s3991_s30, 1  ;;  %p512_p1 = scmp.lt.s32.totalorder %s3991_s30, 5 }
  0x3e   : > { %p513_p2 = pnand %p3391_p0, %p512_p1 }
  0x3f   : > { %s519_s12 = sand.u32 (!%p513_p2), 1, %s3967_s24   ;;  %s4949_s15 = sand.u32 (!%p513_p2), 1, %s3959_s22  }
  0x40   : > { %516 = sbr.rel (%p513_p2) target bundleno = 3501 (0xdad), region = 142  ;;  %s4184_s19 = sshll.u32 (!%p513_p2), %s519_s12, 4 }
  0x41   : > { %s3394_s14 = sshll.u32 (!%p513_p2), %s4949_s15, 4  ;;  %p581_p3 = scmp.lt.s32.totalorder (!%p513_p2), %s3979_s27, 1 }
  0x42   : > { %s3397_s20 = sshll.u32 (!%p513_p2), %s3975_s26, 4  ;;  %s4203_s15 = scalar_lea.vmem (!%p513_p2), [#allocation5], %s3394_s14 }
  0x43   : > { %p587_p4 = scmp.lt.s32.totalorder (!%p513_p2), %s3397_s20, 31  ;;  %p3399_p5 = scmp.ne.s32.totalorder (!%p513_p2), %s3975_s26, 0 }
  0x47   : > { %s582_s9 = scalar_select %p581_p3, %s3979_s27, 1 }
  0x48   : > { %s4998_s20 = smov (!%p587_p4, %s3397_s20), 31  ;;  %596 = sbr.rel (%p3399_p5) target bundleno = 3015 (0xbc7), region = 154 }
  0x49   : > { %s3468_s29 = sshll.u32 %s582_s9, 4  ;;  %s3398_s5 = sshll.u32 %s4998_s20, 2  ;;  %vm602_vm0 = vcmask (!%p3399_p5), 261120   ;;  %v3779_v14 = vld [vmem:[%s4930_s1] sm:$0xff] (!%p3399_p5)   ;;  %v3993_v16 = vmov (!%p3399_p5), 0.0   ;;  %v3781_v17 = vld [vmem:[%s4930_s1 + $0x8] sm:$0xff] (!%p3399_p5)   ;;  %v830_v49 = vlaneseq (!%p3399_p5) }
  0x4a   : > { %s4194_s17 = scalar_lea.vmem %s4929_s0, %s3468_s29  ;;  %s4199_s12 = scalar_lea.vmem %s4935_s6, %s3398_s5  ;;  %v3780_v15 = vld [vmem:[%s4931_s2] sm:$0xff] (!%p3399_p5)   ;;  %3528 = vmatprep.subr.bf16.mxu0 (!%p3399_p5), %v3993_v16  ;;  %3536 = vmatprep.subr.bf16.mxu1 (!%p3399_p5), %v3993_v16  ;;  %v3782_v18 = vld [vmem:[%s4931_s2 + $0x8] sm:$0xff] (!%p3399_p5)   ;;  %vm3994_vm1 = vmmov (!%p3399_p5), 0   ;;  %v3998_v47 = vmov (!%p3399_p5), 1983009808   ;;  %vm1169_vm2 = vcmask (!%p3399_p5), 31744  }
  0x4b   : > { %v597_v8 = vld [vmem:[%s4194_s17] sm:$0xff] (!%p3399_p5)  ;;  %v598_v9 = vld [vmem:[%s4194_s17 + $0x8] sm:$0xff] (!%p3399_p5)  ;;  %3529 = vmatpush3.bf16.msra.mxu0 (!%p3399_p5), %v3779_v14  ;;  %3537 = vmatpush3.bf16.msra.mxu1 (!%p3399_p5), %v3780_v15  ;;  %s3995_s20 = smov (!%p3399_p5), 120   ;;  %s3996_s9 = smov (!%p3399_p5), 112   ;;  %v828_v48 = vunpack.c.l.s4 (!%p3399_p5), %v3998_v47  ;;  %v4269_v51 = vshrl.u32 (!%p3399_p5), %v830_v49, 7  ;;  %vm1765_vm3 = vcmask (!%p3399_p5), 64512  }
  0x4c   : > { %v600_v10 = vmul.f32 (!%p3399_p5), %v597_v8, %v597_v8  ;;  %v601_v11 = vmul.f32 (!%p3399_p5), %v598_v9, %v598_v9  ;;  %3530 = vmatprep.subr.bf16.mxu0 (!%p3399_p5), %v3993_v16  ;;  %3538 = vmatprep.subr.bf16.mxu1 (!%p3399_p5), %v3993_v16  ;;  %v3400_v28 = vld [vmem:[%s4937_s8] ss:$0 sm:$0xff] (!%p3399_p5)  ;;  %v3784_v34 = vld [vmem:[%s4932_s3 + $0x8] sm:$0xff] (!%p3399_p5)   ;;  %s3997_s29 = smov (!%p3399_p5), 104   ;;  %v3999_v52 = vmov (!%p3399_p5), 1934713408  }
  0x4d   : > { %3532 = vmatprep.mubr.msk.bf16.mxu0 (!%p3399_p5), %vm3994_vm1, %v3993_v16  ;;  %3540 = vmatprep.mubr.msk.bf16.mxu1 (!%p3399_p5), %vm3994_vm1, %v3993_v16  ;;  %v3783_v32 = vld [vmem:[%s4932_s3] sm:$0xff] (!%p3399_p5)   ;;  %v829_v50 = vunpack.c.0.s8 (!%p3399_p5), %v828_v48  ;;  %v860_v53 = vunpack.c.l.s4 (!%p3399_p5), %v3999_v52  ;;  %s4950_s16 = smov (!%p3399_p5), 4   ;;  %s4001_s13 = smov (!%p3399_p5), 124   ;;  %vm1936_vm5 = vcmask (!%p3399_p5), 1043456   ;;  %vm2189_vm6 = vcmask (!%p3399_p5), 130048  }
  0x4e   : > { %v603_v12 = vsel (!%p3399_p5), %vm602_vm0, %v600_v10, 0.0  ;;  %v606_v13 = vsel (!%p3399_p5), %vm602_vm0, %v601_v11, 0.0  ;;  %s4003_s24 = smov (!%p3399_p5), 8   ;;  %s4004_s5 = smov (!%p3399_p5), 24   ;;  %vm2191_vm7 = vcmask (!%p3399_p5), 195584   ;;  %vm2267_vm8 = vcmask (!%p3399_p5), 257024  }
  0x4f   : > { %604 = vadd.xlane.f32.xlu0 %v603_v12  ;;  %3531 = vmatpush3.bf16.msra.mxu0 %v3781_v17  ;;  %v4272_v54 = vsub.s32 %v829_v50, %v4269_v51  ;;  %v861_v55 = vunpack.c.0.s8 %v860_v53  ;;  %s4973_s26 = sld [smem:[#allocation18_spill]]  ;;  %vm2999_vm9 = vcmask 261124  }
  0x50   : > { %3539 = vmatpush3.bf16.msra.mxu1 %v3782_v18  ;;  %3544 = vmatprep.subr.bf16.mxu0 %v3993_v16 }
  0x51   : > { %3552 = vmatprep.subr.bf16.mxu1 %v3993_v16  ;;  %v4277_v59 = vsub.s32 %v861_v55, %v4269_v51 }
  0x53   : > { %607 = vadd.xlane.f32.xlu0 %v606_v13 }
  0xdc   : > { %v605_v19 = vpop.xlane.xlu0 %604 }
  0xdd   : > { %v610_v20 = vmul.f32 0.03125, %v605_v19 }
  0xdf   : > { %v612_v21 = vadd.f32 1e-06, %v610_v20 }
  0xe0   : > { %v608_v22 = vpop.xlane.xlu0 %607 }
  0xe1   : > { %3787 = vrsqrt.f32 %v612_v21  ;;  %v611_v23 = vmul.f32 0.03125, %v608_v22 }
  0xe3   : > { %v613_v24 = vadd.f32 1e-06, %v611_v23 }
  0xe5   : > { %3789 = vrsqrt.f32 %v613_v24 }
  0xeb   : > { %v3788_v25 = vpop.eup %3787 }
  0xec   : > { %v616_v26 = vmul.f32 %v3788_v25, %v597_v8 }
  0xee   : > { %v624_v30 = vmul.f32 %v3400_v28, %v616_v26 }
  0xef   : > { %v3790_v27 = vpop.eup %3789 }
  0xf0   : > { %v617_v29 = vmul.f32 %v3790_v27, %v598_v9 }
  0xf2   : > { %v625_v31 = vmul.f32 %v3400_v28, %v617_v29 }
  0xf4   : > { %v626_v33 = vpack.c.bf16 %v625_v31, %v624_v30 }
  0xf6   : > { %3533 = vmatmul.mubr.msk.bf16.vlgmr.msra.gmra.mrb[0].mxu0 %vm602_vm0, %v626_v33  ;;  %3541 = vmatmul.mubr.msk.bf16.vlgmr.msra.gmra.mrb[0].mxu1 %vm602_vm0, %v626_v33 }
  0xf7   : > { %3545 = vmatpush3.bf16.msra.mxu0 %v3783_v32  ;;  %3548 = vmatprep.mubr.msk.bf16.mxu0 %vm3994_vm1, %v3993_v16 }
  0xf8   : > { %3546 = vmatprep.subr.bf16.mxu0 %v3993_v16  ;;  %3554 = vmatprep.mubr.msk.bf16.mxu1 %vm3994_vm1, %v3993_v16 }
  0xfb   : > { %3547 = vmatpush3.bf16.msra.mxu0 %v3784_v34 }
  0xfc   : > { %3558 = vmatprep.subr.bf16.mxu0 %v3993_v16 }
  0xfe   : > { %3549 = vmatmul.mubr.msk.bf16.vlgmr.msra.gmra.mrb[4].mxu0 %vm602_vm0, %v626_v33 }
  0xff   : > { %3560 = vmatprep.mubr.msk.bf16.mxu0 %vm3994_vm1, %v3993_v16 }
 0x1c9   : > { %v4252_v35 = vpop.f32.mrb[0].mxu0  ;;  %v737_v36 = vpop.f32.mrb[0].mxu1 }
 0x1ca   : > { %1216 = vrot.lane.b32.xlu1 %v737_v36, %s3995_s20  ;;  %v3542_v37 = vpop.f32.mrb[1].mxu1  ;;  %807 = vrot.lane.b32.xlu0 %v4252_v35, %s3995_s20  ;;  %v3534_v38 = vpop.f32.mrb[1].mxu0  ;;  %v1222_v56 = vcombine.high %v737_v36, %v3993_v16  ;;  %v1229_v58 = vrot.slane %v737_v36, %v4272_v54 }
 0x1cb   : > { %v4257_v39 = vpop.f32.mrb[2].mxu0  ;;  %v740_v40 = vpop.f32.mrb[2].mxu1 }
 0x1cc   : > { %v3535_v41 = vpop.f32.mrb[3].mxu0  ;;  %v3543_v42 = vpop.f32.mrb[3].mxu1  ;;  %v1236_v62 = vrot.slane %v1222_v56, %v4272_v54  ;;  %v1288_v2 = vcombine.high %v740_v40, %v3993_v16  ;;  %v1295_v8 = vrot.slane %v740_v40, %v4272_v54 }
 0x1ce   : > { %1218 = vrot.lane.b32.xlu1 %v740_v40, %s3995_s20  ;;  %v1302_v15 = vrot.slane %v1288_v2, %v4272_v54 }
 0x1d1   : > { %v4260_v43 = vpop.f32.mrb[4].mxu0 }
 0x1d2   : > { %813 = vrot.lane.b32.xlu1 %v4252_v35, %s3996_s9  ;;  %v3550_v44 = vpop.f32.mrb[5].mxu0 }
 0x1d3   : > { %v4264_v45 = vpop.f32.mrb[6].mxu0 }
 0x1d4   : > { %v3551_v46 = vpop.f32.mrb[7].mxu0 }
 0x1d6   : > { %819 = vrot.lane.b32.xlu1 %v4252_v35, %s3997_s29 }
 0x23c   : > { %v1217_v57 = vpop.permute.xlu1 %1216  ;;  %v808_v31 = vpop.permute.xlu0 %807 }
 0x23d   : > { %v1237_v60 = vcombine.high %v1217_v57, %v3993_v16  ;;  %v1244_v61 = vrot.slane %v1217_v57, %v4272_v54 }
 0x23f   : > { %v1251_v63 = vrot.slane %v1237_v60, %v4272_v54  ;;  %v1252_v0 = vcombine.low %v1229_v58, %v1244_v61  ;;  %v1253_v1 = vcombine.high %v1229_v58, %v1244_v61 }
 0x240   : > { %v1219_v3 = vpop.permute.xlu1 %1218 }
 0x241   : > { %v1260_v4 = vrot.slane %v1252_v0, %v4277_v59  ;;  %v1267_v5 = vrot.slane %v1253_v1, %v4277_v59  ;;  %v1268_v6 = vcombine.low %v1236_v62, %v1251_v63  ;;  %v1269_v7 = vcombine.high %v1236_v62, %v1251_v63 }
 0x242   : > { %v1303_v9 = vcombine.high %v1219_v3, %v3993_v16  ;;  %v1310_v10 = vrot.slane %v1219_v3, %v4272_v54 }
 0x243   : > { %v1276_v11 = vrot.slane %v1268_v6, %v4277_v59  ;;  %v1283_v12 = vrot.slane %v1269_v7, %v4277_v59  ;;  %v1354_v13 = vcombine.low %v1260_v4, %v1267_v5  ;;  %v3414_v14 = vcombine.high %v1260_v4, %v1267_v5 }
 0x244   : > { %v1317_v17 = vrot.slane %v1303_v9, %v4272_v54  ;;  %v1318_v18 = vcombine.low %v1295_v8, %v1310_v10  ;;  %v1319_v19 = vcombine.high %v1295_v8, %v1310_v10  ;;  %v814_v20 = vpop.permute.xlu1 %813 }
 0x245   : > { %v1370_v21 = vcombine.low %v1276_v11, %v1283_v12  ;;  %v3415_v22 = vcombine.high %v1276_v11, %v1283_v12  ;;  %v1361_v23 = vrot.slane %v1354_v13, %v4272_v54  ;;  %v1369_v24 = vrot.slane %v3414_v14, %v4272_v54 }
 0x246   : > { %v1334_v25 = vcombine.low %v1302_v15, %v1317_v17  ;;  %v1335_v26 = vcombine.high %v1302_v15, %v1317_v17  ;;  %v825_v27 = vcombine.low %v4252_v35, %v814_v20  ;;  %v826_v28 = vcombine.high %v4252_v35, %v814_v20 }
 0x247   : > { %v1377_v29 = vrot.slane %v1370_v21, %v4272_v54  ;;  %v1385_v30 = vrot.slane %v3415_v22, %v4272_v54  ;;  %v1326_v32 = vrot.slane %v1318_v18, %v4277_v59  ;;  %v1333_v33 = vrot.slane %v1319_v19, %v4277_v59 }
 0x248   : > { %v1342_v34 = vrot.slane %v1334_v25, %v4277_v59  ;;  %v1349_v36 = vrot.slane %v1335_v26, %v4277_v59  ;;  %v820_v37 = vpop.permute.xlu1 %819  ;;  %v833_v35 = vrot.slane %v825_v27, %v4272_v54  ;;  %v840_v44 = vrot.slane %v826_v28, %v4272_v54 }
 0x249   : > { %v841_v38 = vcombine.low %v808_v31, %v820_v37  ;;  %v842_v40 = vcombine.high %v808_v31, %v820_v37  ;;  %v1386_v48 = vcombine.low %v1361_v23, %v1369_v24  ;;  %v1394_v50 = vcombine.low %v1377_v29, %v1385_v30 }
 0x24a   : > { %v1420_v41 = vcombine.low %v1342_v34, %v1349_v36  ;;  %v3417_v42 = vcombine.high %v1342_v34, %v1349_v36  ;;  %v1404_v52 = vcombine.low %v1326_v32, %v1333_v33  ;;  %v3416_v53 = vcombine.high %v1326_v32, %v1333_v33 }
 0x24b   : > { %v849_v46 = vrot.slane %v841_v38, %v4272_v54  ;;  %v856_v47 = vrot.slane %v842_v40, %v4272_v54  ;;  %v1393_v60 = vrot.slane %v1386_v48, %v4277_v59  ;;  %v1401_v61 = vrot.slane %v1394_v50, %v4277_v59 }
 0x24c   : > { %v1427_v62 = vrot.slane %v1420_v41, %v4272_v54  ;;  %v1435_v63 = vrot.slane %v3417_v42, %v4272_v54  ;;  %v1411_v4 = vrot.slane %v1404_v52, %v4272_v54  ;;  %v1419_v5 = vrot.slane %v3416_v53, %v4272_v54 }
 0x24d   : > { %v857_v55 = vcombine.low %v833_v35, %v849_v46  ;;  %v858_v56 = vcombine.high %v833_v35, %v849_v46  ;;  %v873_v57 = vcombine.low %v840_v44, %v856_v47  ;;  %v874_v58 = vcombine.high %v840_v44, %v856_v47 }
 0x24e   : > { %v4317_v6 = vcombine.low %v1393_v60, %v1401_v61  ;;  %v4322_v12 = vcombine.high %v1393_v60, %v1401_v61  ;;  %v1444_v13 = vcombine.low %v1427_v62, %v1435_v63  ;;  %v1436_v19 = vcombine.low %v1411_v4, %v1419_v5  ;;  %v803_v60 = vld [vmem:[%s4940_s11] sm:$0xff] }
 0x24f   : > { %v865_v0 = vrot.slane %v857_v55, %v4277_v59  ;;  %v872_v1 = vrot.slane %v858_v56, %v4277_v59  ;;  %v881_v2 = vrot.slane %v873_v57, %v4277_v59  ;;  %v888_v3 = vrot.slane %v874_v58, %v4277_v59  ;;  %v801_v63 = vld [vmem:[%s4939_s10] sm:$0xff] }
 0x250   : > { %1478 = vrot.lane.b32.xlu0 %v4317_v6, %s4950_s16  ;;  %v1454_v11 = vsub.f32 0.0, %v4317_v6  ;;  %v1456_v24 = vsub.f32 0.0, %v4322_v12  ;;  %v1451_v25 = vrot.slane %v1444_v13, %v4277_v59  ;;  %v1443_v28 = vrot.slane %v1436_v19, %v4277_v59 }
 0x251   : > { %v961_v7 = vcombine.low %v865_v0, %v872_v1  ;;  %v3410_v8 = vcombine.high %v865_v0, %v872_v1  ;;  %v977_v9 = vcombine.low %v881_v2, %v888_v3  ;;  %v3411_v10 = vcombine.high %v881_v2, %v888_v3  ;;  %v4373_v0 = vld [vmem:[%s4939_s10 + $0x8] sm:$0xff] }
 0x252   : > { %1462 = vrot.lane.b32.xlu1 %v1454_v11, %s4001_s13  ;;  %v1452_v32 = vcombine.low %v1443_v28, %v1451_v25  ;;  %v1453_v37 = vcombine.high %v1443_v28, %v1451_v25  ;;  %v4378_v1 = vld [vmem:[%s4940_s11 + $0x8] sm:$0xff] }
 0x253   : > { %v968_v14 = vrot.slane %v961_v7, %v4272_v54  ;;  %v976_v15 = vrot.slane %v3410_v8, %v4272_v54  ;;  %v984_v17 = vrot.slane %v977_v9, %v4272_v54  ;;  %v992_v18 = vrot.slane %v3411_v10, %v4272_v54 }
 0x254   : > { %1482 = vrot.lane.b32.xlu0 %v4322_v12, %s4950_s16  ;;  %v1455_v35 = vsub.f32 0.0, %v1452_v32  ;;  %v1457_v44 = vsub.f32 0.0, %v1453_v37  ;;  %v1494_v7 = vmul.f32 %v4317_v6, %v801_v63  ;;  %v1495_v8 = vmul.f32 %v1452_v32, %v4373_v0 }
 0x255   : > { %v993_v20 = vcombine.low %v968_v14, %v976_v15  ;;  %v994_v21 = vcombine.high %v968_v14, %v976_v15  ;;  %v1009_v22 = vcombine.low %v984_v17, %v992_v18  ;;  %v1010_v23 = vcombine.high %v984_v17, %v992_v18 }
 0x256   : > { %1466 = vrot.lane.b32.xlu1 %v1456_v24, %s4001_s13  ;;  %v1496_v18 = vmul.f32 %v4322_v12, %v801_v63 }
 0x257   : > { %v1001_v26 = vrot.slane %v993_v20, %v4277_v59  ;;  %v1017_v27 = vrot.slane %v1009_v22, %v4277_v59  ;;  %v1008_v30 = vrot.slane %v994_v21, %v4277_v59  ;;  %v1024_v31 = vrot.slane %v1010_v23, %v4277_v59 }
 0x258   : > { %v1497_v21 = vmul.f32 %v1453_v37, %v4373_v0 }
 0x259   : > { %v4337_v29 = vcombine.low %v1001_v26, %v1017_v27  ;;  %v4345_v34 = vcombine.low %v1008_v30, %v1024_v31  ;;  %v1026_v36 = vcombine.high %v1001_v26, %v1017_v27  ;;  %v4350_v41 = vcombine.high %v1008_v30, %v1024_v31 }
 0x25a   : > { %1480 = vrot.lane.b32.xlu1 %v1452_v32, %s4950_s16 }
 0x25b   : > { %1145 = vrot.lane.b32.xlu0 %v4337_v29, %s4950_s16  ;;  %v1097_v33 = vsub.f32 0.0, %v4337_v29  ;;  %v1101_v38 = vsub.f32 0.0, %v4345_v34  ;;  %v1099_v40 = vsub.f32 0.0, %v1026_v36  ;;  %v1103_v42 = vsub.f32 0.0, %v4350_v41 }
 0x25c   : > { %v1178_v25 = vmul.f32 %v4337_v29, %v801_v63  ;;  %v1180_v28 = vmul.f32 %v1026_v36, %v801_v63  ;;  %v1182_v29 = vmul.f32 %v4345_v34, %v801_v63 }
 0x25e   : > { %1484 = vrot.lane.b32.xlu1 %v1453_v37, %s4950_s16 }
 0x25f   : > { %1113 = vrot.lane.b32.xlu0 %v1097_v33, %s4001_s13 }
 0x262   : > { %1117 = vrot.lane.b32.xlu1 %v1099_v40, %s4001_s13 }
 0x263   : > { %1121 = vrot.lane.b32.xlu0 %v1101_v38, %s4001_s13 }
 0x266   : > { %1125 = vrot.lane.b32.xlu1 %v1103_v42, %s4001_s13 }
 0x267   : > { %1153 = vrot.lane.b32.xlu0 %v4345_v34, %s4950_s16 }
 0x26a   : > { %1464 = vrot.lane.b32.xlu1 %v1455_v35, %s4001_s13 }
 0x26e   : > { %1468 = vrot.lane.b32.xlu1 %v1457_v44, %s4001_s13 }
 0x272   : > { %1149 = vrot.lane.b32.xlu1 %v1026_v36, %s4950_s16  ;;  %v1184_v36 = vmul.f32 %v4350_v41, %v801_v63 }
 0x276   : > { %1157 = vrot.lane.b32.xlu1 %v4350_v41, %s4950_s16  ;;  %s4972_s16 = smov 4  }
 0x2c2   : > { %v1479_v46 = vpop.permute.xlu0 %1478 }
 0x2c4   : > { %v1463_v47 = vpop.permute.xlu1 %1462 }
 0x2c5   : > { %v1490_v61 = vsel %vm1169_vm2, %v1463_v47, %v1479_v46 }
 0x2c6   : > { %v1483_v50 = vpop.permute.xlu0 %1482  ;;  %v1498_v2 = vmul.f32 %v1490_v61, %v803_v60 }
 0x2c8   : > { %v1467_v48 = vpop.permute.xlu1 %1466  ;;  %v1502_v11 = vadd.f32 %v1498_v2, %v1494_v7 }
 0x2c9   : > { %v1492_v4 = vsel %vm1169_vm2, %v1467_v48, %v1483_v50 }
 0x2ca   : > { %v1500_v13 = vmul.f32 %v1492_v4, %v803_v60 }
 0x2cc   : > { %v1481_v52 = vpop.permute.xlu1 %1480  ;;  %v1504_v24 = vadd.f32 %v1500_v13, %v1496_v18 }
 0x2cd   : > { %v1146_v53 = vpop.permute.xlu0 %1145 }
 0x2d0   : > { %v1485_v55 = vpop.permute.xlu1 %1484 }
 0x2d1   : > { %v1114_v56 = vpop.permute.xlu0 %1113 }
 0x2d2   : > { %v1170_v10 = vsel %vm1169_vm2, %v1114_v56, %v1146_v53 }
 0x2d3   : > { %v1186_v20 = vmul.f32 %v1170_v10, %v803_v60 }
 0x2d4   : > { %v1118_v57 = vpop.permute.xlu1 %1117 }
 0x2d5   : > { %v1122_v62 = vpop.permute.xlu0 %1121  ;;  %v1194_v31 = vadd.f32 %v1186_v20, %v1178_v25 }
 0x2d7   : > { %v1202_v44 = vmul.f32 0.35355338, %v1194_v31 }
 0x2d8   : > { %v1126_v58 = vpop.permute.xlu1 %1125 }
 0x2d9   : > { %v1154_v14 = vpop.permute.xlu0 %1153 }
 0x2da   : > { %v1174_v23 = vsel %vm1169_vm2, %v1122_v62, %v1154_v14 }
 0x2db   : > { %v1190_v32 = vmul.f32 %v1174_v23, %v803_v60 }
 0x2dc   : > { %v1465_v3 = vpop.permute.xlu1 %1464 }
 0x2dd   : > { %v1491_v5 = vsel %vm1169_vm2, %v1465_v3, %v1481_v52  ;;  %v1198_v46 = vadd.f32 %v1190_v32, %v1182_v29 }
 0x2de   : > { %v1499_v9 = vmul.f32 %v1491_v5, %v4378_v1 }
 0x2df   : > { %v1206_v52 = vmul.f32 0.35355338, %v1198_v46 }
 0x2e0   : > { %v1503_v15 = vadd.f32 %v1499_v9, %v1495_v8  ;;  %v1469_v17 = vpop.permute.xlu1 %1468 }
 0x2e1   : > { %v1493_v19 = vsel %vm1169_vm2, %v1469_v17, %v1485_v55  ;;  %v1758_v55 = vand.u32 127, %v830_v49 }
 0x2e2   : > { %v1501_v6 = vmul.f32 %v1493_v19, %v4378_v1  ;;  %v4390_v22 = vpack.c.bf16 %v1503_v15, %v1502_v11  ;;  %v1516_v19 = vcombine.high %v4260_v43, %v3993_v16 }
 0x2e3   : > { %vm4420_vm4 = vcmp.le.s32.totalorder %v1758_v55, %v4269_v51 }
 0x2e4   : > { %v1505_v26 = vadd.f32 %v1501_v6, %v1497_v21  ;;  %v1150_v27 = vpop.permute.xlu1 %1149  ;;  %v4396_v12 = vsel %vm1765_vm3, %v4390_v22, 0  ;;  %v1530_v31 = vrot.slane %v1516_v19, %v4272_v54 }
 0x2e5   : > { %v1172_v30 = vsel %vm1169_vm2, %v1118_v57, %v1150_v27  ;;  %3553 = vmatpush3.bf16.xpose.msra.mxu1 %v4396_v12 }
 0x2e6   : > { %v1188_v33 = vmul.f32 %v1172_v30, %v803_v60  ;;  %v4400_v37 = vpack.c.bf16 %v1505_v26, %v1504_v24  ;;  %3564 = vmatprep.subr.bf16.mxu1 %v3993_v16  ;;  %v1523_v26 = vrot.slane %v4260_v43, %v4272_v54 }
 0x2e8   : > { %v1196_v38 = vadd.f32 %v1188_v33, %v1180_v28  ;;  %v1158_v40 = vpop.permute.xlu1 %1157  ;;  %v4406_v42 = vsel %vm1765_vm3, %v4400_v37, 0 }
 0x2e9   : > { %v1176_v35 = vsel %vm1169_vm2, %v1126_v58, %v1158_v40  ;;  %3559 = vmatpush3.bf16.xpose.msra.mxu0 %v4406_v42 }
 0x2ea   : > { %v1204_v47 = vmul.f32 0.35355338, %v1196_v38  ;;  %v1192_v48 = vmul.f32 %v1176_v35, %v803_v60  ;;  %3570 = vmatprep.subr.bf16.mxu0 %v3993_v16  ;;  %v1582_v35 = vcombine.high %v4264_v45, %v3993_v16 }
 0x2ec   : > { %v3469_v50 = vpack.c.bf16 %v1204_v47, %v1202_v44  ;;  %v1200_v34 = vadd.f32 %v1192_v48, %v1184_v36 }
 0x2ee   : > { %v1208_v53 = vmul.f32 0.35355338, %v1200_v34  ;;  %3555 = vmatmul.mubr.msk.bf16.vlgmr.msra.gmra.mrb[4].mxu1 %vm1765_vm3, %v3469_v50 }
 0x2ef   : > { %3566 = vmatprep.mubr.msk.bf16.mxu1 %vm3994_vm1, %v3993_v16 }
 0x2f0   : > { %v3470_v41 = vpack.c.bf16 %v1208_v53, %v1206_v52  ;;  %v1589_v52 = vrot.slane %v4264_v45, %v4272_v54 }
 0x2f2   : > { %3561 = vmatmul.mubr.msk.bf16.vlgmr.msra.gmra.mrb[8].mxu0 %vm1765_vm3, %v3470_v41 }
 0x2f3   : > { %3572 = vmatprep.mubr.msk.bf16.mxu0 %vm3994_vm1, %v3993_v16 }
 0x3c1   : > { %v1806_v57 = vpop.f32.mrb[4].mxu1 }
 0x3c2   : > { %v1867_v58 = vsel %vm4420_vm4, %v1806_v57, -1e+30  ;;  %v3556_v60 = vpop.f32.mrb[5].mxu1 }
 0x3c3   : > { %v1809_v61 = vpop.f32.mrb[6].mxu1  ;;  %v1871_v62 = vsel %vm1765_vm3, %v1867_v58, -inf  ;;  %v1596_v60 = vrot.slane %v1582_v35, %v4272_v54 }
 0x3c4   : > { %v1868_v63 = vsel %vm4420_vm4, %v1809_v61, -1e+30  ;;  %1872 = vmax.xlane.f32.xlu0 %v1871_v62  ;;  %v3557_v2 = vpop.f32.mrb[7].mxu1 }
 0x3c5   : > { %v1858_v3 = vpop.f32.mrb[8].mxu0  ;;  %v1874_v49 = vsel %vm1765_vm3, %v1868_v63, -inf }
 0x3c6   : > { %v1869_v51 = vsel %vm4420_vm4, %v1858_v3, -1e+30  ;;  %1875 = vmax.xlane.f32.xlu1 %v1874_v49  ;;  %v3562_v4 = vpop.f32.mrb[9].mxu0 }
 0x3c7   : > { %v1861_v5 = vpop.f32.mrb[10].mxu0  ;;  %v1877_v7 = vsel %vm1765_vm3, %v1869_v51, -inf }
 0x3c8   : > { %v1870_v8 = vsel %vm4420_vm4, %v1861_v5, -1e+30  ;;  %1878 = vmax.xlane.f32.xlu0 %v1877_v7  ;;  %v3563_v9 = vpop.f32.mrb[11].mxu0 }
 0x3c9   : > { %v1880_v10 = vsel %vm1765_vm3, %v1870_v8, -inf }
 0x3cc   : > { %1881 = vmax.xlane.f32.xlu0 %v1880_v10 }
 0x3d7   : > { %1510 = vrot.lane.b32.xlu1 %v4260_v43, %s3995_s20 }
 0x3db   : > { %809 = vrot.lane.b32.xlu1 %v4257_v39, %s3995_s20 }
 0x3e2   : > { %1512 = vrot.lane.b32.xlu0 %v4264_v45, %s3995_s20  ;;  %s4971_s20 = sld [smem:[#allocation15_spill]] }
 0x451   : > { %v4442_v11 = vpop.xlane.xlu0 %1872 }
 0x452   : > { %v1883_v13 = vmax.f32 %v4442_v11, -1e+30 }
 0x453   : > { %v4445_v14 = vpop.xlane.xlu1 %1875 }
 0x454   : > { %v1899_v15 = vsub.f32 %v1867_v58, %v1883_v13  ;;  %v1884_v17 = vmax.f32 %v4445_v14, -1e+30 }
 0x455   : > { %v4450_v18 = vpop.xlane.xlu0 %1878 }
 0x456   : > { %v1903_v20 = vmul.f32 1.442695, %v1899_v15  ;;  %v1900_v21 = vsub.f32 %v1868_v63, %v1884_v17  ;;  %v1885_v6 = vmax.f32 %v4450_v18, -1e+30 }
 0x457   : > { %v1511_v23 = vpop.permute.xlu1 %1510 }
 0x458   : > { %v1905_v24 = vmul.f32 1.442695, %v1900_v21  ;;  %v1531_v25 = vcombine.high %v1511_v23, %v3993_v16  ;;  %3791 = vpow2.f32 %v1903_v20  ;;  %v1901_v27 = vsub.f32 %v1869_v51, %v1885_v6 }
 0x459   : > { %v1538_v28 = vrot.slane %v1511_v23, %v4272_v54  ;;  %v4463_v30 = vpop.xlane.xlu0 %1881 }
 0x45a   : > { %v1545_v32 = vrot.slane %v1531_v25, %v4272_v54  ;;  %v1886_v33 = vmax.f32 %v4463_v30, -1e+30  ;;  %3793 = vpow2.f32 %v1905_v24  ;;  %v1907_v29 = vmul.f32 1.442695, %v1901_v27 }
 0x45b   : > { %v1546_v38 = vcombine.low %v1523_v26, %v1538_v28  ;;  %v1547_v40 = vcombine.high %v1523_v26, %v1538_v28  ;;  %v810_v11 = vpop.permute.xlu1 %809 }
 0x45c   : > { %v1562_v36 = vcombine.low %v1530_v31, %v1545_v32  ;;  %v1563_v43 = vcombine.high %v1530_v31, %v1545_v32  ;;  %v1902_v46 = vsub.f32 %v1870_v8, %v1886_v33  ;;  %3795 = vpow2.f32 %v1907_v29 }
 0x45d   : > { %v1554_v44 = vrot.slane %v1546_v38, %v4277_v59  ;;  %v1513_v47 = vpop.permute.xlu0 %1512  ;;  %v1561_v48 = vrot.slane %v1547_v40, %v4277_v59 }
 0x45e   : > { %v1570_v50 = vrot.slane %v1562_v36, %v4277_v59  ;;  %v1577_v34 = vrot.slane %v1563_v43, %v4277_v59  ;;  %v1909_v53 = vmul.f32 1.442695, %v1902_v46  ;;  %v1597_v41 = vcombine.high %v1513_v47, %v3993_v16 }
 0x45f   : > { %v1604_v55 = vrot.slane %v1513_v47, %v4272_v54  ;;  %v1648_v2 = vcombine.low %v1554_v44, %v1561_v48  ;;  %v3418_v3 = vcombine.high %v1554_v44, %v1561_v48 }
 0x460   : > { %v1664_v57 = vcombine.low %v1570_v50, %v1577_v34  ;;  %v3419_v58 = vcombine.high %v1570_v50, %v1577_v34  ;;  %v1611_v61 = vrot.slane %v1597_v41, %v4272_v54  ;;  %3797 = vpow2.f32 %v1909_v53 }
 0x461   : > { %v1612_v62 = vcombine.low %v1589_v52, %v1604_v55  ;;  %v1613_v63 = vcombine.high %v1589_v52, %v1604_v55  ;;  %v1655_v21 = vrot.slane %v1648_v2, %v4272_v54  ;;  %v1663_v23 = vrot.slane %v3418_v3, %v4272_v54 }
 0x462   : > { %v3792_v49 = vpop.eup %3791  ;;  %v1628_v4 = vcombine.low %v1596_v60, %v1611_v61  ;;  %v1671_v5 = vrot.slane %v1664_v57, %v4272_v54  ;;  %v1679_v7 = vrot.slane %v3419_v58, %v4272_v54  ;;  %v1629_v8 = vcombine.high %v1596_v60, %v1611_v61 }
 0x463   : > { %v1620_v51 = vrot.slane %v1612_v62, %v4277_v59  ;;  %v1627_v45 = vrot.slane %v1613_v63, %v4277_v59  ;;  %v1915_v9 = vsel %vm1765_vm3, %v3792_v49, 0.0  ;;  %v1680_v43 = vcombine.low %v1655_v21, %v1663_v23 }
 0x464   : > { %v3794_v10 = vpop.eup %3793  ;;  %v1636_v15 = vrot.slane %v1628_v4, %v4277_v59  ;;  %1916 = vadd.xlane.f32.xlu1 %v1915_v9  ;;  %v1643_v24 = vrot.slane %v1629_v8, %v4277_v59  ;;  %v1688_v29 = vcombine.low %v1671_v5, %v1679_v7  ;;  %v1888_v5 = vsub.f32 -1e+30, %v1884_v17 }
 0x465   : > { %v1698_v19 = vcombine.low %v1620_v51, %v1627_v45  ;;  %v3420_v20 = vcombine.high %v1620_v51, %v1627_v45  ;;  %v1918_v25 = vsel %vm1765_vm3, %v3794_v10, 0.0  ;;  %v1687_v50 = vrot.slane %v1680_v43, %v4277_v59 }
 0x466   : > { %1919 = vadd.xlane.f32.xlu0 %v1918_v25  ;;  %v3796_v28 = vpop.eup %3795  ;;  %v1714_v31 = vcombine.low %v1636_v15, %v1643_v24  ;;  %v3421_v32 = vcombine.high %v1636_v15, %v1643_v24  ;;  %v1695_v44 = vrot.slane %v1688_v29, %v4277_v59  ;;  %v1931_v3 = vpack.c.bf16 %v3794_v10, %v3792_v49 }
 0x467   : > { %v1705_v26 = vrot.slane %v1698_v19, %v4272_v54  ;;  %v1713_v27 = vrot.slane %v3420_v20, %v4272_v54  ;;  %v1921_v38 = vsel %vm1765_vm3, %v3796_v28, 0.0  ;;  %v1887_v49 = vsub.f32 -1e+30, %v1883_v13 }
 0x468   : > { %v1721_v40 = vrot.slane %v1714_v31, %v4272_v54  ;;  %v1729_v36 = vrot.slane %v3421_v32, %v4272_v54  ;;  %1922 = vadd.xlane.f32.xlu1 %v1921_v38  ;;  %v1696_v53 = vcombine.low %v1687_v50, %v1695_v44  ;;  %v1697_v55 = vcombine.high %v1687_v50, %v1695_v44 }
 0x469   : > { %v1730_v35 = vcombine.low %v1705_v26, %v1713_v27  ;;  %v1891_v7 = vmul.f32 1.442695, %v1887_v49  ;;  %v1889_v8 = vsub.f32 -1e+30, %v1885_v6  ;;  %v1893_v9 = vmul.f32 1.442695, %v1888_v5 }
 0x46a   : > { %v1738_v46 = vcombine.low %v1721_v40, %v1729_v36  ;;  %v3798_v47 = vpop.eup %3797 }
 0x46b   : > { %v1924_v48 = vsel %vm1765_vm3, %v3798_v47, 0.0  ;;  %v1737_v34 = vrot.slane %v1730_v35, %v4277_v59  ;;  %v1932_v51 = vpack.c.bf16 %v3798_v47, %v3796_v28  ;;  %3799 = vpow2.f32 %v1891_v7 }
 0x46c   : > { %v1745_v52 = vrot.slane %v1738_v46, %v4277_v59  ;;  %1925 = vadd.xlane.f32.xlu0 %v1924_v48  ;;  %v1895_v10 = vmul.f32 1.442695, %v1889_v8  ;;  %3801 = vpow2.f32 %v1893_v9 }
 0x46e   : > { %v1746_v41 = vcombine.low %v1737_v34, %v1745_v52  ;;  %v1747_v57 = vcombine.high %v1737_v34, %v1745_v52  ;;  %3803 = vpow2.f32 %v1895_v10 }
 0x470   : > { %v1748_v58 = vpack.c.bf16 %v1746_v41, %v1696_v53  ;;  %v1749_v60 = vpack.c.bf16 %v1747_v57, %v1697_v55 }
 0x472   : > { %v4502_v61 = vsel %vm1936_vm5, %v1748_v58, 0  ;;  %v4504_v62 = vsel %vm1936_vm5, %v1749_v60, 0  ;;  %v2680_v63 = vrot.slane %v1748_v58, 4  ;;  %v2729_v2 = vrot.slane %v1749_v60, 4 }
 0x473   : > { %3565 = vmatpush3.bf16.msra.mxu1 %v4502_v61  ;;  %3571 = vmatpush3.bf16.msra.mxu0 %v4504_v62 }
 0x474   : > { %3584 = vmatprep.subr.bf16.mxu0 %v3993_v16  ;;  %3576 = vmatprep.subr.bf16.mxu1 %v3993_v16  ;;  %v4510_v45 = vsel %vm1936_vm5, %v2680_v63, 0  ;;  %v4512_v4 = vsel %vm1936_vm5, %v2729_v2, 0 }
 0x475   : > { %v3800_v19 = vpop.eup %3799 }
 0x476   : > { %3567 = vmatmul.mubr.msk.bf16.vlgmr.msra.gmra.mrb[8].mxu1 %vm1765_vm3, %v1931_v3  ;;  %3573 = vmatmul.mubr.msk.bf16.vlgmr.msra.gmra.mrb[12].mxu0 %vm1765_vm3, %v1932_v51  ;;  %v3802_v13 = vpop.eup %3801  ;;  %v4534_v20 = vmul.f32 0.0, %v3800_v19 }
 0x477   : > { %3586 = vmatprep.mubr.msk.bf16.mxu0 %vm3994_vm1, %v3993_v16  ;;  %3580 = vmatprep.mubr.msk.bf16.mxu1 %vm3994_vm1, %v3993_v16  ;;  %v4539_v6 = vmul.f32 0.0, %v3802_v13 }
 0x478   : > { %v3804_v17 = vpop.eup %3803 }
 0x479   : > { %821 = vrot.lane.b32.xlu1 %v4257_v39, %s3997_s29  ;;  %v4544_v30 = vmul.f32 0.0, %v3804_v17 }
 0x47c   : > { %3585 = vmatpush3.bf16.xpose.msra.mxu0 %v4396_v12  ;;  %v1890_v12 = vsub.f32 -1e+30, %v1886_v33 }
 0x47d   : > { %3596 = vmatprep.subr.bf16.mxu0 %v3993_v16 }
 0x47e   : > { %v1897_v15 = vmul.f32 1.442695, %v1890_v12 }
 0x480   : > { %3805 = vpow2.f32 %v1897_v15 }
 0x482   : > { %815 = vrot.lane.b32.xlu0 %v4257_v39, %s3996_s9 }
 0x48a   : > { %v3806_v24 = vpop.eup %3805 }
 0x48b   : > { %v4547_v26 = vmul.f32 0.0, %v3806_v24 }
 0x4f1   : > { %v1917_v14 = vpop.xlane.xlu1 %1916 }
 0x4f2   : > { %v4537_v18 = vadd.f32 %v1917_v14, %v4534_v20 }
 0x4f3   : > { %v1920_v21 = vpop.xlane.xlu0 %1919 }
 0x4f4   : > { %v4542_v23 = vadd.f32 %v1920_v21, %v4539_v6  ;;  %3807 = vrcp.f32 %v4537_v18 }
 0x4f5   : > { %v1923_v33 = vpop.xlane.xlu1 %1922 }
 0x4f6   : > { %v1929_v25 = vadd.f32 %v1923_v33, %v4544_v30 }
 0x4f8   : > { %3809 = vrcp.f32 %v1929_v25 }
 0x4f9   : > { %v822_v27 = vpop.permute.xlu1 %821  ;;  %v1926_v28 = vpop.xlane.xlu0 %1925  ;;  %3811 = vrcp.f32 %v4542_v23 }
 0x4fa   : > { %v1930_v31 = vadd.f32 %v1926_v28, %v4547_v26  ;;  %v909_v32 = vcombine.low %v810_v11, %v822_v27  ;;  %v910_v29 = vcombine.high %v810_v11, %v822_v27  ;;  %v4587_v27 = vld [vmem:[%s4971_s20] sm:$0xff]   ;;  %v4593_v28 = vld [vmem:[%s4971_s20 + $0x8] sm:$0xff]  }
 0x4fb   : > { %3577 = vmatpush3.bf16.msra.mxu1 %v4587_v27 }
 0x4fc   : > { %v917_v43 = vrot.slane %v909_v32, %v4272_v54  ;;  %v924_v35 = vrot.slane %v910_v29, %v4272_v54  ;;  %3578 = vmatprep.subr.bf16.mxu1 %v3993_v16  ;;  %3813 = vrcp.f32 %v1930_v31 }
 0x4fd   : > { %v816_v38 = vpop.permute.xlu0 %815 }
 0x4fe   : > { %v893_v40 = vcombine.low %v4257_v39, %v816_v38  ;;  %v894_v36 = vcombine.high %v4257_v39, %v816_v38  ;;  %v3808_v38 = vpop.eup %3807 }
 0x4ff   : > { %3579 = vmatpush3.bf16.msra.mxu1 %v4593_v28 }
 0x500   : > { %v901_v44 = vrot.slane %v893_v40, %v4272_v54  ;;  %v908_v46 = vrot.slane %v894_v36, %v4272_v54  ;;  %3590 = vmatprep.subr.bf16.mxu1 %v3993_v16 }
 0x502   : > { %v925_v47 = vcombine.low %v901_v44, %v917_v43  ;;  %v926_v48 = vcombine.high %v901_v44, %v917_v43  ;;  %v941_v50 = vcombine.low %v908_v46, %v924_v35  ;;  %v942_v34 = vcombine.high %v908_v46, %v924_v35  ;;  %v3810_v44 = vpop.eup %3809 }
 0x504   : > { %v933_v52 = vrot.slane %v925_v47, %v4277_v59  ;;  %v940_v53 = vrot.slane %v926_v48, %v4277_v59  ;;  %v949_v41 = vrot.slane %v941_v50, %v4277_v59  ;;  %v956_v39 = vrot.slane %v942_v34, %v4277_v59  ;;  %v3812_v48 = vpop.eup %3811 }
 0x506   : > { %v1029_v55 = vcombine.low %v933_v52, %v940_v53  ;;  %v3412_v57 = vcombine.high %v933_v52, %v940_v53  ;;  %v1045_v58 = vcombine.low %v949_v41, %v956_v39  ;;  %v3413_v60 = vcombine.high %v949_v41, %v956_v39  ;;  %v3814_v52 = vpop.eup %3813 }
 0x508   : > { %v1036_v63 = vrot.slane %v1029_v55, %v4272_v54  ;;  %v1044_v2 = vrot.slane %v3412_v57, %v4272_v54  ;;  %v1052_v3 = vrot.slane %v1045_v58, %v4272_v54  ;;  %v1060_v51 = vrot.slane %v3413_v60, %v4272_v54 }
 0x50a   : > { %v1061_v49 = vcombine.low %v1036_v63, %v1044_v2  ;;  %v1077_v5 = vcombine.low %v1052_v3, %v1060_v51  ;;  %v1062_v7 = vcombine.high %v1036_v63, %v1044_v2  ;;  %v1078_v8 = vcombine.high %v1052_v3, %v1060_v51 }
 0x50c   : > { %v1069_v9 = vrot.slane %v1061_v49, %v4277_v59  ;;  %v1085_v10 = vrot.slane %v1077_v5, %v4277_v59  ;;  %v1076_v12 = vrot.slane %v1062_v7, %v4277_v59  ;;  %v1092_v15 = vrot.slane %v1078_v8, %v4277_v59 }
 0x50e   : > { %v4568_v19 = vcombine.high %v1069_v9, %v1085_v10  ;;  %v4570_v11 = vcombine.low %v1069_v9, %v1085_v10  ;;  %v4574_v17 = vcombine.high %v1076_v12, %v1092_v15  ;;  %v4576_v21 = vcombine.low %v1076_v12, %v1092_v15 }
 0x510   : > { %v1100_v13 = vsub.f32 0.0, %v4568_v19  ;;  %v1098_v14 = vsub.f32 0.0, %v4570_v11  ;;  %v1104_v33 = vsub.f32 0.0, %v4574_v17  ;;  %v1102_v24 = vsub.f32 0.0, %v4576_v21 }
 0x512   : > { %1119 = vrot.lane.b32.xlu1 %v1100_v13, %s4001_s13  ;;  %1115 = vrot.lane.b32.xlu0 %v1098_v14, %s4001_s13 }
 0x516   : > { %1127 = vrot.lane.b32.xlu1 %v1104_v33, %s4001_s13  ;;  %1123 = vrot.lane.b32.xlu0 %v1102_v24, %s4001_s13  ;;  %s4002_s13 = smov 16  }
 0x51a   : > { %1151 = vrot.lane.b32.xlu1 %v4568_v19, %s4972_s16  ;;  %1147 = vrot.lane.b32.xlu0 %v4570_v11, %s4972_s16 }
 0x549   : > { %v1974_v32 = vpop.f32.mrb[8].mxu1  ;;  %v2021_v29 = vpop.f32.mrb[12].mxu0 }
 0x54a   : > { %v2028_v40 = vadd.f32 %v1974_v32, %v4534_v20  ;;  %v2030_v36 = vadd.f32 %v2021_v29, %v4544_v30  ;;  %v3568_v43 = vpop.f32.mrb[9].mxu1  ;;  %v3574_v35 = vpop.f32.mrb[13].mxu0 }
 0x54b   : > { %v1977_v46 = vpop.f32.mrb[10].mxu1  ;;  %v2024_v47 = vpop.f32.mrb[14].mxu0 }
 0x54c   : > { %v2036_v50 = vmul.f32 %v3808_v38, %v2028_v40  ;;  %v2038_v34 = vmul.f32 %v3810_v44, %v2030_v36  ;;  %v2029_v18 = vadd.f32 %v1977_v46, %v4539_v6  ;;  %v2031_v23 = vadd.f32 %v2024_v47, %v4547_v26  ;;  %v3569_v25 = vpop.f32.mrb[11].mxu1  ;;  %v3575_v31 = vpop.f32.mrb[15].mxu0 }
 0x54e   : > { %v2040_v53 = vcombine.low %v2036_v50, %v2038_v34  ;;  %v2041_v41 = vcombine.high %v2036_v50, %v2038_v34  ;;  %v2037_v20 = vmul.f32 %v3812_v48, %v2029_v18  ;;  %v2039_v39 = vmul.f32 %v3814_v52, %v2031_v23 }
 0x550   : > { %v2056_v30 = vcombine.low %v2037_v20, %v2039_v39  ;;  %v2057_v55 = vcombine.high %v2037_v20, %v2039_v39  ;;  %v2048_v57 = vrot.slane %v2040_v53, %v4272_v54  ;;  %v2055_v58 = vrot.slane %v2041_v41, %v4272_v54 }
 0x551   : > { %v1181_v41 = vmul.f32 %v4568_v19, %v4373_v0  ;;  %v1179_v39 = vmul.f32 %v4570_v11, %v4373_v0 }
 0x552   : > { %v2064_v60 = vrot.slane %v2056_v30, %v4272_v54  ;;  %v2071_v63 = vrot.slane %v2057_v55, %v4272_v54 }
 0x554   : > { %v2072_v6 = vcombine.low %v2048_v57, %v2064_v60  ;;  %v2073_v2 = vcombine.high %v2048_v57, %v2064_v60  ;;  %v2088_v26 = vcombine.low %v2055_v58, %v2071_v63  ;;  %v2089_v3 = vcombine.high %v2055_v58, %v2071_v63 }
 0x556   : > { %v2080_v51 = vrot.slane %v2072_v6, %v4277_v59  ;;  %v2087_v49 = vrot.slane %v2073_v2, %v4277_v59  ;;  %v2096_v5 = vrot.slane %v2088_v26, %v4277_v59  ;;  %v2103_v7 = vrot.slane %v2089_v3, %v4277_v59 }
 0x558   : > { %v2108_v8 = vcombine.low %v2080_v51, %v2087_v49  ;;  %v3428_v9 = vcombine.high %v2080_v51, %v2087_v49  ;;  %v2124_v10 = vcombine.low %v2096_v5, %v2103_v7  ;;  %v3429_v12 = vcombine.high %v2096_v5, %v2103_v7 }
 0x559   : > { %v1183_v7 = vmul.f32 %v4576_v21, %v4373_v0 }
 0x55a   : > { %v2115_v15 = vrot.slane %v2108_v8, %v4272_v54  ;;  %v2123_v13 = vrot.slane %v3428_v9, %v4272_v54  ;;  %v2131_v14 = vrot.slane %v2124_v10, %v4272_v54  ;;  %v2139_v33 = vrot.slane %v3429_v12, %v4272_v54 }
 0x55b   : > { %v1185_v12 = vmul.f32 %v4574_v17, %v4373_v0 }
 0x55c   : > { %v2141_v24 = vcombine.high %v2115_v15, %v2123_v13  ;;  %v2157_v32 = vcombine.high %v2131_v14, %v2139_v33  ;;  %v2140_v29 = vcombine.low %v2115_v15, %v2123_v13  ;;  %v2156_v38 = vcombine.low %v2131_v14, %v2139_v33 }
 0x55e   : > { %v2155_v40 = vrot.slane %v2141_v24, %v4277_v59  ;;  %v2171_v36 = vrot.slane %v2157_v32, %v4277_v59  ;;  %v2148_v43 = vrot.slane %v2140_v29, %v4277_v59  ;;  %v2164_v35 = vrot.slane %v2156_v38, %v4277_v59  ;;  %v3859_v38 = vld [vmem:[%s4194_s17] sm:$0xff] }
 0x560   : > { %v2174_v44 = vcombine.low %v2155_v40, %v2171_v36  ;;  %v2173_v46 = vcombine.high %v2148_v43, %v2164_v35  ;;  %v2175_v47 = vcombine.high %v2155_v40, %v2171_v36  ;;  %v2172_v48 = vcombine.low %v2148_v43, %v2164_v35 }
 0x562   : > { %2181 = vrot.lane.b32.xlu0 %v2174_v44, %s4002_s13  ;;  %2177 = vrot.lane.b32.xlu1 %v2173_v46, %s4003_s24 }
 0x566   : > { %1155 = vrot.lane.b32.xlu0 %v4576_v21, %s4972_s16  ;;  %2185 = vrot.lane.b32.xlu1 %v2175_v47, %s4004_s5 }
 0x56a   : > { %1159 = vrot.lane.b32.xlu1 %v4574_v17, %s4972_s16 }
 0x584   : > { %v1120_v50 = vpop.permute.xlu1 %1119  ;;  %v1116_v34 = vpop.permute.xlu0 %1115 }
 0x588   : > { %v1128_v18 = vpop.permute.xlu1 %1127  ;;  %v1124_v23 = vpop.permute.xlu0 %1123 }
 0x58c   : > { %v1152_v25 = vpop.permute.xlu1 %1151  ;;  %v1148_v31 = vpop.permute.xlu0 %1147 }
 0x58d   : > { %v1173_v52 = vsel %vm1169_vm2, %v1120_v50, %v1152_v25  ;;  %v1171_v53 = vsel %vm1169_vm2, %v1116_v34, %v1148_v31 }
 0x58e   : > { %v1189_v20 = vmul.f32 %v1173_v52, %v4378_v1  ;;  %v1187_v30 = vmul.f32 %v1171_v53, %v4378_v1 }
 0x590   : > { %v1197_v55 = vadd.f32 %v1189_v20, %v1181_v41  ;;  %v1195_v57 = vadd.f32 %v1187_v30, %v1179_v39  ;;  %v2518_v39 = vrot.slane %v4390_v22, 4 }
 0x592   : > { %v1205_v58 = vmul.f32 0.35355338, %v1197_v55  ;;  %v1203_v60 = vmul.f32 0.35355338, %v1195_v57  ;;  %v2520_v57 = vsel %vm1765_vm3, %v2518_v39, 0 }
 0x594   : > { %v4639_v63 = vpack.c.bf16 %v1205_v58, %v1203_v60 }
 0x596   : > { %3587 = vmatmul.mubr.msk.bf16.vlgmr.msra.gmra.mrb[16].mxu0 %vm1765_vm3, %v4639_v63 }
 0x597   : > { %3597 = vmatpush3.bf16.msra.mxu0 %v4502_v61  ;;  %3598 = vmatprep.mubr.msk.bf16.mxu0 %vm3994_vm1, %v3993_v16 }
 0x598   : > { %3608 = vmatprep.subr.bf16.mxu0 %v3993_v16 }
 0x5d4   : > { %v2182_v19 = vpop.permute.xlu0 %2181  ;;  %v2178_v11 = vpop.permute.xlu1 %2177 }
 0x5d5   : > { %v2188_v6 = vsel %vm1765_vm3, %v2172_v48, %v2178_v11 }
 0x5d6   : > { %v2190_v3 = vsel %vm2189_vm6, %v2188_v6, %v2182_v19 }
 0x5d8   : > { %v1156_v2 = vpop.permute.xlu0 %1155  ;;  %v2186_v26 = vpop.permute.xlu1 %2185 }
 0x5d9   : > { %v1175_v51 = vsel %vm1169_vm2, %v1124_v23, %v1156_v2  ;;  %v2192_v49 = vsel %vm2191_vm7, %v2190_v3, %v2186_v26 }
 0x5da   : > { %v1191_v61 = vmul.f32 %v1175_v51, %v4378_v1  ;;  %v2193_v5 = vpack.c.bf16 %v2192_v49, %v2192_v49 }
 0x5dc   : > { %v1160_v8 = vpop.permute.xlu1 %1159  ;;  %3581 = vmatmul.mubr.msk.bf16.vlgmr.msra.gmra.mrb[12].mxu1 %vm602_vm0, %v2193_v5  ;;  %v1199_v10 = vadd.f32 %v1191_v61, %v1183_v7 }
 0x5dd   : > { %v1177_v9 = vsel %vm1169_vm2, %v1128_v18, %v1160_v8  ;;  %3591 = vmatpush3.bf16.xpose.msra.mxu1 %v4406_v42  ;;  %3592 = vmatprep.mubr.msk.bf16.mxu1 %vm3994_vm1, %v3993_v16 }
 0x5de   : > { %v1193_v15 = vmul.f32 %v1177_v9, %v4378_v1  ;;  %3602 = vmatprep.subr.bf16.mxu1 %v3993_v16  ;;  %v1207_v21 = vmul.f32 0.35355338, %v1199_v10 }
 0x5e0   : > { %v1201_v13 = vadd.f32 %v1193_v15, %v1185_v12 }
 0x5e2   : > { %v1209_v14 = vmul.f32 0.35355338, %v1201_v13 }
 0x5e4   : > { %v4663_v33 = vpack.c.bf16 %v1209_v14, %v1207_v21 }
 0x5e6   : > { %3593 = vmatmul.mubr.msk.bf16.vlgmr.msra.gmra.mrb[16].mxu1 %vm1765_vm3, %v4663_v33 }
 0x5e7   : > { %3603 = vmatpush3.bf16.msra.mxu1 %v4504_v62  ;;  %3604 = vmatprep.mubr.msk.bf16.mxu1 %vm3994_vm1, %v3993_v16 }
 0x5e8   : > { %3614 = vmatprep.subr.bf16.mxu1 %v3993_v16 }
 0x669   : > { %v2311_v0 = vpop.f32.mrb[16].mxu0 }
 0x66a   : > { %v3588_v1 = vpop.f32.mrb[17].mxu0  ;;  %v2363_v42 = vsel %vm1765_vm3, %v2311_v0, -inf }
 0x66b   : > { %2364 = vmax.xlane.f32.xlu0 %v2363_v42  ;;  %v2314_v17 = vpop.f32.mrb[18].mxu0 }
 0x66c   : > { %v3589_v24 = vpop.f32.mrb[19].mxu0  ;;  %v2366_v32 = vsel %vm1765_vm3, %v2314_v17, -inf }
 0x66d   : > { %2367 = vmax.xlane.f32.xlu1 %v2366_v32 }
 0x6af   : > { %v2243_v29 = vpop.f32.mrb[12].mxu1 }
 0x6b0   : > { %v4674_v40 = vadd.f32 %v3859_v38, %v2243_v29  ;;  %v3582_v62 = vpop.f32.mrb[13].mxu1 }
 0x6b1   : > { %v2246_v36 = vpop.f32.mrb[14].mxu1 }
 0x6b2   : > { %2250 = vst.msk [vmem:[%s4203_s15] sm:$0xff] %vm602_vm0, %v4674_v40  ;;  %v3583_v43 = vpop.f32.mrb[15].mxu1 }
 0x6b9   : > { %v2356_v35 = vpop.f32.mrb[16].mxu1 }
 0x6ba   : > { %v3594_v44 = vpop.f32.mrb[17].mxu1  ;;  %v2369_v46 = vsel %vm1765_vm3, %v2356_v35, -inf }
 0x6bb   : > { %v2359_v47 = vpop.f32.mrb[18].mxu1  ;;  %2370 = vmax.xlane.f32.xlu0 %v2369_v46 }
 0x6bc   : > { %v3595_v48 = vpop.f32.mrb[19].mxu1  ;;  %v2372_v50 = vsel %vm1765_vm3, %v2359_v47, -inf }
 0x6bf   : > { %2373 = vmax.xlane.f32.xlu0 %v2372_v50 }
 0x6f8   : > { %v2365_v34 = vpop.xlane.xlu0 %2364 }
 0x6f9   : > { %v4681_v18 = vmax.f32 %v2365_v34, -1e+30 }
 0x6fa   : > { %v2368_v23 = vpop.xlane.xlu1 %2367 }
 0x6fb   : > { %v2391_v25 = vsub.f32 %v2311_v0, %v4681_v18  ;;  %v4684_v31 = vmax.f32 %v2368_v23, -1e+30  ;;  %v2379_v46 = vsub.f32 -1e+30, %v4681_v18 }
 0x6fd   : > { %v2395_v52 = vmul.f32 1.442695, %v2391_v25  ;;  %v2392_v53 = vsub.f32 %v2314_v17, %v4684_v31  ;;  %v2383_v48 = vmul.f32 1.442695, %v2379_v46 }
 0x6ff   : > { %v2397_v41 = vmul.f32 1.442695, %v2392_v53  ;;  %3815 = vpow2.f32 %v2395_v52 }
 0x701   : > { %3817 = vpow2.f32 %v2397_v41 }
 0x709   : > { %v4687_v20 = vpop.eup %3815 }
 0x70a   : > { %v2407_v43 = vsel %vm1765_vm3, %v4687_v20, 0.0 }
 0x70b   : > { %v4690_v30 = vpop.eup %3817 }
 0x70c   : > { %v2423_v55 = vpack.c.bf16 %v4690_v30, %v4687_v20 }
 0x70e   : > { %3599 = vmatmul.mubr.msk.bf16.vlgmr.msra.gmra.mrb[20].mxu0 %vm1765_vm3, %v2423_v55 }
 0x70f   : > { %3609 = vmatpush3.bf16.xpose.msra.mxu0 %v2520_v57  ;;  %3610 = vmatprep.mubr.msk.bf16.mxu0 %vm3994_vm1, %v3993_v16 }
 0x710   : > { %3620 = vmatprep.subr.bf16.mxu0 %v3993_v16 }
 0x716   : > { %3611 = vmatmul.mubr.msk.bf16.vlgmr.msra.gmra.mrb[24].mxu0 %vm1765_vm3, %v4639_v63  ;;  %v2564_v63 = vrot.slane %v4400_v37, 4 }
 0x717   : > { %3621 = vmatpush3.bf16.msra.mxu0 %v4510_v45  ;;  %3622 = vmatprep.mubr.msk.bf16.mxu0 %vm3994_vm1, %v3993_v16 }
 0x718   : > { %3632 = vmatprep.subr.bf16.mxu0 %v3993_v16  ;;  %v2566_v49 = vsel %vm1765_vm3, %v2564_v63, 0 }
 0x748   : > { %v2371_v22 = vpop.xlane.xlu0 %2370 }
 0x749   : > { %v4705_v58 = vmax.f32 %v2371_v22, -1e+30 }
 0x74b   : > { %v2393_v60 = vsub.f32 %v2356_v35, %v4705_v58  ;;  %v2410_v35 = vsel %vm1765_vm3, %v4690_v30, 0.0 }
 0x74c   : > { %v2374_v19 = vpop.xlane.xlu0 %2373 }
 0x74d   : > { %v4708_v11 = vmax.f32 %v2374_v19, -1e+30  ;;  %v2399_v6 = vmul.f32 1.442695, %v2393_v60 }
 0x74f   : > { %v2394_v2 = vsub.f32 %v2359_v47, %v4708_v11  ;;  %3819 = vpow2.f32 %v2399_v6  ;;  %v2380_v47 = vsub.f32 -1e+30, %v4684_v31 }
 0x751   : > { %v2401_v26 = vmul.f32 1.442695, %v2394_v2  ;;  %v2385_v50 = vmul.f32 1.442695, %v2380_v47 }
 0x753   : > { %3821 = vpow2.f32 %v2401_v26 }
 0x754   : > { %3823 = vpow2.f32 %v2383_v48 }
 0x755   : > { %3825 = vpow2.f32 %v2385_v50 }
 0x759   : > { %v3820_v45 = vpop.eup %3819 }
 0x75a   : > { %v2413_v44 = vsel %vm1765_vm3, %v3820_v45, 0.0 }
 0x75d   : > { %v3822_v3 = vpop.eup %3821 }
 0x75e   : > { %v2424_v51 = vpack.c.bf16 %v3822_v3, %v3820_v45  ;;  %v2416_v56 = vsel %vm1765_vm3, %v3822_v3, 0.0  ;;  %v3824_v60 = vpop.eup %3823 }
 0x75f   : > { %v3826_v19 = vpop.eup %3825  ;;  %v4758_v6 = vmul.f32 0.0, %v3824_v60 }
 0x760   : > { %3605 = vmatmul.mubr.msk.bf16.vlgmr.msra.gmra.mrb[20].mxu1 %vm1765_vm3, %v2424_v51  ;;  %v4761_v2 = vmul.f32 0.0, %v3826_v19 }
 0x761   : > { %3615 = vmatpush3.bf16.xpose.msra.mxu1 %v2566_v49  ;;  %3616 = vmatprep.mubr.msk.bf16.mxu1 %vm3994_vm1, %v3993_v16 }
 0x762   : > { %3626 = vmatprep.subr.bf16.mxu1 %v3993_v16 }
 0x768   : > { %3617 = vmatmul.mubr.msk.bf16.vlgmr.msra.gmra.mrb[24].mxu1 %vm1765_vm3, %v4663_v33 }
 0x769   : > { %3627 = vmatpush3.bf16.msra.mxu1 %v4512_v4  ;;  %3628 = vmatprep.mubr.msk.bf16.mxu1 %vm3994_vm1, %v3993_v16 }
 0x7e1   : > { %v2462_v37 = vpop.f32.mrb[20].mxu0 }
 0x7e2   : > { %v3600_v61 = vpop.f32.mrb[21].mxu0 }
 0x7e3   : > { %v4722_v5 = vpop.f32.mrb[22].mxu0 }
 0x7e4   : > { %v3601_v7 = vpop.f32.mrb[23].mxu0 }
 0x7e9   : > { %v2556_v8 = vpop.f32.mrb[24].mxu0 }
 0x7ea   : > { %v2609_v9 = vsel %vm4420_vm4, %v2556_v8, -1e+30  ;;  %v3612_v10 = vpop.f32.mrb[25].mxu0  ;;  %v2382_v8 = vsub.f32 -1e+30, %v4708_v11 }
 0x7eb   : > { %v2559_v12 = vpop.f32.mrb[26].mxu0  ;;  %v2613_v15 = vsel %vm1765_vm3, %v2609_v9, -inf }
 0x7ec   : > { %v2610_v13 = vsel %vm4420_vm4, %v2559_v12, -1e+30  ;;  %2614 = vmax.xlane.f32.xlu1 %v2613_v15  ;;  %v3613_v4 = vpop.f32.mrb[27].mxu0  ;;  %v2389_v10 = vmul.f32 1.442695, %v2382_v8 }
 0x7ed   : > { %v2616_v21 = vsel %vm1765_vm3, %v2610_v13, -inf }
 0x7ee   : > { %2617 = vmax.xlane.f32.xlu0 %v2616_v21 }
 0x833   : > { %v4730_v14 = vpop.f32.mrb[20].mxu1 }
 0x834   : > { %v3606_v33 = vpop.f32.mrb[21].mxu1 }
 0x835   : > { %v4732_v0 = vpop.f32.mrb[22].mxu1 }
 0x836   : > { %v3607_v1 = vpop.f32.mrb[23].mxu1 }
 0x83b   : > { %v2602_v42 = vpop.f32.mrb[24].mxu1 }
 0x83c   : > { %v4736_v17 = vsel %vm4420_vm4, %v2602_v42, -1e+30  ;;  %v3618_v24 = vpop.f32.mrb[25].mxu1 }
 0x83d   : > { %v2605_v32 = vpop.f32.mrb[26].mxu1  ;;  %v2619_v29 = vsel %vm1765_vm3, %v4736_v17, -inf }
 0x83e   : > { %v4742_v38 = vsel %vm4420_vm4, %v2605_v32, -1e+30  ;;  %v3619_v62 = vpop.f32.mrb[27].mxu1  ;;  %2620 = vmax.xlane.f32.xlu1 %v2619_v29 }
 0x83f   : > { %v2622_v36 = vsel %vm1765_vm3, %v4742_v38, -inf }
 0x840   : > { %2623 = vmax.xlane.f32.xlu0 %v2622_v36 }
 0x842   : > { %2408 = vadd.xlane.f32.xlu1 %v2407_v43 }
 0x844   : > { %2411 = vadd.xlane.f32.xlu0 %v2410_v35 }
 0x846   : > { %2414 = vadd.xlane.f32.xlu1 %v2413_v44 }
 0x848   : > { %2417 = vadd.xlane.f32.xlu0 %v2416_v56 }
 0x879   : > { %v2615_v34 = vpop.xlane.xlu1 %2614 }
 0x87a   : > { %v2625_v23 = vmax.f32 %v4681_v18, %v2615_v34 }
 0x87b   : > { %v2618_v25 = vpop.xlane.xlu0 %2617 }
 0x87c   : > { %v2629_v52 = vsub.f32 %v4681_v18, %v2625_v23  ;;  %v2641_v53 = vsub.f32 %v2609_v9, %v2625_v23  ;;  %v2626_v41 = vmax.f32 %v4684_v31, %v2618_v25  ;;  %v2513_v18 = vadd.f32 %v2462_v37, %v4758_v6 }
 0x87e   : > { %v2633_v20 = vmul.f32 1.442695, %v2629_v52  ;;  %v2645_v39 = vmul.f32 1.442695, %v2641_v53  ;;  %v2630_v30 = vsub.f32 %v4684_v31, %v2626_v41  ;;  %v2642_v55 = vsub.f32 %v2610_v13, %v2626_v41 }
 0x87f   : > { %v2514_v31 = vadd.f32 %v4722_v5, %v4761_v2  ;;  %v2381_v5 = vsub.f32 -1e+30, %v4705_v58 }
 0x880   : > { %3827 = vpow2.f32 %v2633_v20  ;;  %v2635_v57 = vmul.f32 1.442695, %v2630_v30  ;;  %v2647_v22 = vmul.f32 1.442695, %v2642_v55 }
 0x881   : > { %3829 = vpow2.f32 %v2645_v39  ;;  %v2387_v9 = vmul.f32 1.442695, %v2381_v5 }
 0x882   : > { %3831 = vpow2.f32 %v2635_v57 }
 0x883   : > { %3833 = vpow2.f32 %v2647_v22 }
 0x884   : > { %3835 = vpow2.f32 %v2387_v9 }
 0x885   : > { %3837 = vpow2.f32 %v2389_v10 }
 0x88a   : > { %v4763_v26 = vpop.eup %3827 }
 0x88b   : > { %v3830_v45 = vpop.eup %3829  ;;  %v4768_v63 = vmul.f32 %v4763_v26, %v2513_v18 }
 0x88c   : > { %v4770_v3 = vpop.eup %3831  ;;  %v2657_v51 = vsel %vm1765_vm3, %v3830_v45, 0.0 }
 0x88d   : > { %v3834_v49 = vpop.eup %3833  ;;  %2658 = vadd.xlane.f32.xlu1 %v2657_v51  ;;  %v4774_v61 = vmul.f32 %v4770_v3, %v2514_v31 }
 0x88e   : > { %v2660_v37 = vsel %vm1765_vm3, %v3834_v49, 0.0  ;;  %v2677_v7 = vpack.c.bf16 %v3834_v49, %v3830_v45  ;;  %v3836_v32 = vpop.eup %3835 }
 0x88f   : > { %2661 = vadd.xlane.f32.xlu0 %v2660_v37  ;;  %v3838_v29 = vpop.eup %3837  ;;  %v2405_v62 = vmul.f32 0.0, %v3836_v32 }
 0x890   : > { %3623 = vmatmul.mubr.msk.bf16.vlgmr.msra.gmra.mrb[28].mxu0 %vm1765_vm3, %v2677_v7 }
 0x891   : > { %3633 = vmatpush3.bf16.msra.mxu0 %v4587_v27  ;;  %3636 = vmatprep.mubr.msk.bf16.mxu0 %vm3994_vm1, %v3993_v16 }
 0x892   : > { %3634 = vmatprep.subr.bf16.mxu0 %v3993_v16 }
 0x895   : > { %3635 = vmatpush3.bf16.msra.mxu0 %v4593_v28 }
 0x8cb   : > { %v2621_v12 = vpop.xlane.xlu1 %2620 }
 0x8cc   : > { %v2627_v15 = vmax.f32 %v4705_v58, %v2621_v12 }
 0x8cd   : > { %v2624_v13 = vpop.xlane.xlu0 %2623 }
 0x8ce   : > { %v2631_v27 = vsub.f32 %v4705_v58, %v2627_v15  ;;  %v2643_v4 = vsub.f32 %v4736_v17, %v2627_v15  ;;  %v2628_v16 = vmax.f32 %v4708_v11, %v2624_v13  ;;  %v2515_v58 = vadd.f32 %v4730_v14, %v2405_v62 }
 0x8cf   : > { %v2406_v17 = vmul.f32 0.0, %v3838_v29  ;;  %v2409_v50 = vpop.xlane.xlu1 %2408 }
 0x8d0   : > { %v2637_v21 = vmul.f32 1.442695, %v2631_v27  ;;  %v2649_v28 = vmul.f32 1.442695, %v2643_v4  ;;  %v2632_v33 = vsub.f32 %v4708_v11, %v2628_v16  ;;  %v2644_v1 = vsub.f32 %v4742_v38, %v2628_v16 }
 0x8d1   : > { %v2516_v35 = vadd.f32 %v4732_v0, %v2406_v17  ;;  %v2412_v14 = vpop.xlane.xlu0 %2411  ;;  %v2419_v23 = vadd.f32 %v2409_v50, %v4758_v6 }
 0x8d2   : > { %3839 = vpow2.f32 %v2637_v21  ;;  %v2639_v42 = vmul.f32 1.442695, %v2632_v33  ;;  %v2651_v24 = vmul.f32 1.442695, %v2644_v1  ;;  %v2420_v0 = vadd.f32 %v2412_v14, %v4761_v2 }
 0x8d3   : > { %3841 = vpow2.f32 %v2649_v28  ;;  %v2415_v34 = vpop.xlane.xlu1 %2414  ;;  %v2653_v53 = vmul.f32 %v4763_v26, %v2419_v23 }
 0x8d4   : > { %3843 = vpow2.f32 %v2639_v42  ;;  %v2654_v39 = vmul.f32 %v4770_v3, %v2420_v0  ;;  %v2421_v26 = vadd.f32 %v2415_v34, %v2405_v62 }
 0x8d5   : > { %3845 = vpow2.f32 %v2651_v24  ;;  %v2418_v25 = vpop.xlane.xlu0 %2417 }
 0x8d6   : > { %v2422_v49 = vadd.f32 %v2418_v25, %v2406_v17 }
 0x8dc   : > { %v3840_v36 = vpop.eup %3839 }
 0x8dd   : > { %v3842_v43 = vpop.eup %3841  ;;  %v2675_v44 = vmul.f32 %v3840_v36, %v2515_v58  ;;  %v2655_v37 = vmul.f32 %v3840_v36, %v2421_v26 }
 0x8de   : > { %v3844_v11 = vpop.eup %3843  ;;  %v2663_v38 = vsel %vm1765_vm3, %v3842_v43, 0.0 }
 0x8df   : > { %v3846_v56 = vpop.eup %3845  ;;  %2664 = vadd.xlane.f32.xlu1 %v2663_v38  ;;  %v2676_v46 = vmul.f32 %v3844_v11, %v2516_v35  ;;  %v2656_v5 = vmul.f32 %v3844_v11, %v2422_v49 }
 0x8e0   : > { %v2666_v47 = vsel %vm1765_vm3, %v3846_v56, 0.0  ;;  %v2678_v48 = vpack.c.bf16 %v3846_v56, %v3842_v43 }
 0x8e1   : > { %2667 = vadd.xlane.f32.xlu0 %v2666_v47 }
 0x8e2   : > { %3629 = vmatmul.mubr.msk.bf16.vlgmr.msra.gmra.mrb[28].mxu1 %vm1765_vm3, %v2678_v48 }
 0x91a   : > { %v2659_v52 = vpop.xlane.xlu1 %2658 }
 0x91b   : > { %v2669_v20 = vadd.f32 %v2659_v52, %v2653_v53 }
 0x91c   : > { %v2662_v41 = vpop.xlane.xlu0 %2661 }
 0x91d   : > { %v2670_v30 = vadd.f32 %v2662_v41, %v2654_v39  ;;  %3847 = vrcp.f32 %v2669_v20 }
 0x91f   : > { %3849 = vrcp.f32 %v2670_v30 }
 0x927   : > { %v3848_v60 = vpop.eup %3847 }
 0x929   : > { %v3850_v45 = vpop.eup %3849 }
 0x963   : > { %v2721_v55 = vpop.f32.mrb[28].mxu0 }
 0x964   : > { %v2777_v57 = vadd.f32 %v2721_v55, %v4768_v63  ;;  %v3624_v22 = vpop.f32.mrb[29].mxu0 }
 0x965   : > { %v2724_v19 = vpop.f32.mrb[30].mxu0 }
 0x966   : > { %v2785_v6 = vmul.f32 %v3848_v60, %v2777_v57  ;;  %v2778_v18 = vadd.f32 %v2724_v19, %v4774_v61  ;;  %v3625_v2 = vpop.f32.mrb[31].mxu0 }
 0x968   : > { %v2786_v31 = vmul.f32 %v3850_v45, %v2778_v18 }
 0x96c   : > { %v2665_v51 = vpop.xlane.xlu1 %2664 }
 0x96d   : > { %v2671_v7 = vadd.f32 %v2665_v51, %v2655_v37 }
 0x96e   : > { %v2668_v3 = vpop.xlane.xlu0 %2667 }
 0x96f   : > { %v2672_v8 = vadd.f32 %v2668_v3, %v2656_v5  ;;  %3851 = vrcp.f32 %v2671_v7  ;;  %v3433_v3 = vld [vmem:[%s4973_s26] ss:$0 sm:$0xff] }
 0x971   : > { %3853 = vrcp.f32 %v2672_v8 }
 0x979   : > { %v3852_v12 = vpop.eup %3851 }
 0x97b   : > { %v3854_v4 = vpop.eup %3853 }
 0x9b5   : > { %v2770_v63 = vpop.f32.mrb[28].mxu1 }
 0x9b6   : > { %v2779_v9 = vadd.f32 %v2770_v63, %v2675_v44  ;;  %v3630_v10 = vpop.f32.mrb[29].mxu1 }
 0x9b7   : > { %v2773_v15 = vpop.f32.mrb[30].mxu1 }
 0x9b8   : > { %v2787_v13 = vmul.f32 %v3852_v12, %v2779_v9  ;;  %v2780_v61 = vadd.f32 %v2773_v15, %v2676_v46  ;;  %v3631_v27 = vpop.f32.mrb[31].mxu1  ;;  %v3860_v9 = vld [vmem:[%s4194_s17 + $0x8] sm:$0xff] }
 0x9ba   : > { %v2789_v16 = vcombine.low %v2785_v6, %v2787_v13  ;;  %v2790_v21 = vcombine.high %v2785_v6, %v2787_v13  ;;  %v2788_v28 = vmul.f32 %v3854_v4, %v2780_v61 }
 0x9bc   : > { %v2805_v33 = vcombine.low %v2786_v31, %v2788_v28  ;;  %v2806_v1 = vcombine.high %v2786_v31, %v2788_v28  ;;  %v2797_v42 = vrot.slane %v2789_v16, %v4272_v54  ;;  %v2804_v24 = vrot.slane %v2790_v21, %v4272_v54 }
 0x9be   : > { %v2813_v32 = vrot.slane %v2805_v33, %v4272_v54  ;;  %v2820_v29 = vrot.slane %v2806_v1, %v4272_v54 }
 0x9c0   : > { %v2821_v62 = vcombine.low %v2797_v42, %v2813_v32  ;;  %v2822_v58 = vcombine.high %v2797_v42, %v2813_v32  ;;  %v2837_v17 = vcombine.low %v2804_v24, %v2820_v29  ;;  %v2838_v36 = vcombine.high %v2804_v24, %v2820_v29 }
 0x9c2   : > { %v2829_v43 = vrot.slane %v2821_v62, %v4277_v59  ;;  %v2836_v35 = vrot.slane %v2822_v58, %v4277_v59  ;;  %v2845_v44 = vrot.slane %v2837_v17, %v4277_v59  ;;  %v2852_v11 = vrot.slane %v2838_v36, %v4277_v59 }
 0x9c4   : > { %v2857_v38 = vcombine.low %v2829_v43, %v2836_v35  ;;  %v3444_v56 = vcombine.high %v2829_v43, %v2836_v35  ;;  %v2873_v46 = vcombine.low %v2845_v44, %v2852_v11  ;;  %v3445_v47 = vcombine.high %v2845_v44, %v2852_v11 }
 0x9c6   : > { %v2864_v48 = vrot.slane %v2857_v38, %v4272_v54  ;;  %v2872_v50 = vrot.slane %v3444_v56, %v4272_v54  ;;  %v2880_v14 = vrot.slane %v2873_v46, %v4272_v54  ;;  %v2888_v34 = vrot.slane %v3445_v47, %v4272_v54 }
 0x9c7   : > { %v2251_v54 = vmul.f32 %v4674_v40, %v4674_v40 }
 0x9c8   : > { %v2890_v23 = vcombine.high %v2864_v48, %v2872_v50  ;;  %v2906_v25 = vcombine.high %v2880_v14, %v2888_v34  ;;  %v2889_v0 = vcombine.low %v2864_v48, %v2872_v50  ;;  %v2905_v52 = vcombine.low %v2880_v14, %v2888_v34 }
 0x9c9   : > { %v2252_v60 = vsel %vm602_vm0, %v2251_v54, 0.0 }
 0x9ca   : > { %v2904_v53 = vrot.slane %v2890_v23, %v4277_v59  ;;  %v2920_v41 = vrot.slane %v2906_v25, %v4277_v59  ;;  %v2897_v20 = vrot.slane %v2889_v0, %v4277_v59  ;;  %v2913_v39 = vrot.slane %v2905_v52, %v4277_v59 }
 0x9cc   : > { %v2923_v30 = vcombine.low %v2904_v53, %v2920_v41  ;;  %v2922_v55 = vcombine.high %v2897_v20, %v2913_v39  ;;  %v2924_v57 = vcombine.high %v2904_v53, %v2920_v41  ;;  %v2921_v22 = vcombine.low %v2897_v20, %v2913_v39 }
 0x9ce   : > { %2930 = vrot.lane.b32.xlu0 %v2923_v30, %s4002_s13  ;;  %2926 = vrot.lane.b32.xlu1 %v2922_v55, %s4003_s24 }
 0x9d2   : > { %2934 = vrot.lane.b32.xlu1 %v2924_v57, %s4004_s5 }
 0x9ed   : > { %2253 = vadd.xlane.f32.xlu0 %v2252_v60 }
 0xa40   : > { %v2927_v19 = vpop.permute.xlu1 %2926  ;;  %v2931_v6 = vpop.permute.xlu0 %2930 }
 0xa41   : > { %v2937_v59 = vsel %vm1765_vm3, %v2921_v22, %v2927_v19 }
 0xa42   : > { %v2938_v2 = vsel %vm2189_vm6, %v2937_v59, %v2931_v6 }
 0xa44   : > { %v2935_v18 = vpop.permute.xlu1 %2934 }
 0xa45   : > { %v2939_v45 = vsel %vm2191_vm7, %v2938_v2, %v2935_v18 }
 0xa46   : > { %v2940_v31 = vpack.c.bf16 %v2939_v45, %v2939_v45 }
 0xa48   : > { %3637 = vmatmul.mubr.msk.bf16.vlgmr.msra.gmra.mrb[32].mxu0 %vm602_vm0, %v2940_v31 }
 0xa7a   : > { %v2254_v26 = vpop.xlane.xlu0 %2253 }
 0xa7b   : > { %v2255_v51 = vmul.f32 0.03125, %v2254_v26 }
 0xa7d   : > { %v2256_v49 = vadd.f32 1e-06, %v2255_v51 }
 0xa7f   : > { %3855 = vrsqrt.f32 %v2256_v49 }
 0xa89   : > { %v3856_v37 = vpop.eup %3855 }
 0xa8a   : > { %v2258_v7 = vmul.f32 %v3856_v37, %v4674_v40 }
 0xa8c   : > { %v2265_v5 = vmul.f32 %v3433_v3, %v2258_v7 }
 0xa8e   : > { %v2266_v8 = vpack.c.bf16 %v2265_v5, %v2265_v5 }
 0xa90   : > { %2268 = vst.msk [vmem:[#allocation2] sm:$0xf] %vm2267_vm8, %v2266_v8 }
 0xb1b   : > { %v2978_v63 = vpop.f32.mrb[32].mxu0 }
 0xb1c   : > { %v2984_v10 = vadd.f32 %v3860_v9, %v2978_v63  ;;  %v3638_v12 = vpop.f32.mrb[33].mxu0 }
 0xb1d   : > { %v2981_v15 = vpop.f32.mrb[34].mxu0 }
 0xb1e   : > { %2985 = vst.msk [vmem:[%s4203_s15 + $0x8] sm:$0xff] %vm602_vm0, %v2984_v10  ;;  %v3639_v13 = vpop.f32.mrb[35].mxu0  ;;  %v2986_v61 = vmul.f32 %v2984_v10, %v2984_v10 }
 0xb20   : > { %v2987_v27 = vsel %vm602_vm0, %v2986_v61, 0.0 }
 0xb21   : > { %2988 = vadd.xlane.f32.xlu1 %v2987_v27 }
 0xbae   : > { %v2989_v4 = vpop.xlane.xlu1 %2988 }
 0xbaf   : > { %v2990_v16 = vmul.f32 0.03125, %v2989_v4 }
 0xbb1   : > { %v2991_v21 = vadd.f32 1e-06, %v2990_v16 }
 0xbb3   : > { %3857 = vrsqrt.f32 %v2991_v21 }
 0xbbd   : > { %v3858_v40 = vpop.eup %3857 }
 0xbbe   : > { %v2993_v28 = vmul.f32 %v3858_v40, %v2984_v10 }
 0xbc0   : > { %v2994_v33 = vmul.f32 %v3433_v3, %v2993_v28 }
 0xbc2   : > { %v2995_v1 = vpack.c.bf16 %v2994_v33, %v2994_v33 }
 0xbc4   : > { %v2997_v42 = vrot.slane %v2995_v1, 4 }
 0xbc6   : > { %3000 = vst.msk [vmem:[#allocation2] sm:$0xf0] %vm2999_vm9, %v2997_v42 }
 0xbc7 PF: > { %s4974_s17 = scalar_lea.vmem [#allocation3], %s4184_s19  ;;  %v4005_v32 = vmov 0.0   ;;  %vm4006_vm10 = vmmov 0   ;;  %vm3018_vm11 = vcmask 261120   ;;  %s4976_s28 = scalar_lea.vmem [#allocation4], %s4184_s19  ;;  %v3865_v36 = vld [vmem:[%s4199_s12] sm:$0xff]  }
 0xbc8   : > { %v3861_v24 = vld [vmem:[%s4974_s17] sm:$0xff]   ;;  %3640 = vmatprep.subr.bf16.mxu1 %v4005_v32  ;;  %3656 = vmatprep.subr.bf16.mxu0 %v4005_v32  ;;  %s4975_s25 = smov %s4974_s17  ;;  %s4977_s9 = smov %s4976_s28  ;;  %v3867_v35 = vld [vmem:[%s4199_s12 + $0x10] sm:$0xff]   ;;  %v3869_v11 = vld [vmem:[%s4199_s12 + $0x20] sm:$0xff]  }
 0xbc9   : > { %3641 = vmatpush3.bf16.msra.mxu1 %v3861_v24  ;;  %v3862_v29 = vld [vmem:[%s4975_s25 + $0x8] sm:$0xff]   ;;  %3644 = vmatprep.mubr.msk.bf16.mxu1 %vm4006_vm10, %v4005_v32  ;;  %v3868_v44 = vld [vmem:[%s4199_s12 + $0x18] sm:$0xff]   ;;  %v3871_v56 = vld [vmem:[%s4199_s12 + $0x30] sm:$0xff]   ;;  %s3473_s19 = sshll.u32 %s3979_s27, 8  ;;  %s4978_s13 = sld [smem:[#allocation19_spill]] }
 0xbca   : > { %3642 = vmatprep.subr.bf16.mxu1 %v4005_v32  ;;  %3672 = vmatprep.mubr.msk.bf16.mxu0 %vm4006_vm10, %v4005_v32  ;;  %v3863_v58 = vld [vmem:[%s4976_s28] sm:$0xff]   ;;  %v3138_v2 = vld [vmem:[%s4203_s15 + $0x8] sm:$0xff]  ;;  %s4979_s27 = sand.u32 1, %s3959_s22   ;;  %s4007_s14 = smov [#allocation5]  }
 0xbcb   : > { %v3864_v17 = vld [vmem:[%s4977_s9 + $0x8] sm:$0xff]   ;;  %3657 = vmatpush3.bf16.msra.mxu0 %v3865_v36  ;;  %v3872_v46 = vld [vmem:[%s4199_s12 + $0x38] sm:$0xff]   ;;  %s4871_s5 = scalar_lea.sflag [#allocation6], %s4979_s27  ;;  %s3885_s26 = sshll.u32 %s4007_s14, 4  ;;  %s3886_s26 = int_to_ptr.vmem [resolvable:$false] %s3885_s26 }
 0xbcc   : > { %3658 = vmatprep.subr.bf16.mxu0 %v4005_v32  ;;  %v3866_v43 = vld [vmem:[%s4199_s12 + $0x8] sm:$0xff]   ;;  %s3887_s17 = scalar_lea.vmem %s3886_s26, 512 }
 0xbcd   : > { %v3001_v62 = vld [vmem:[#allocation2] sm:$0xff]  ;;  %3643 = vmatpush3.bf16.msra.mxu1 %v3862_v29  ;;  %v3870_v38 = vld [vmem:[%s4199_s12 + $0x28] sm:$0xff]   ;;  %s3262_s12 = sshll.u32 %s4203_s15, 4  ;;  %s4863_s12 = int_to_ptr.vmem [resolvable:$true] %s3262_s12 }
 0xbce   : > { %3648 = vmatprep.subr.bf16.mxu1 %v4005_v32  ;;  %v3137_v59 = vld [vmem:[%s4203_s15] sm:$0xff]  ;;  %s3881_s7 = scalar_lea.vmem %s4863_s12, 256  ;;  %p3888_p9 = scmp.lt.s32.totalorder %s4863_s12, %s3886_s26 }
 0xbcf   : > { %3659 = vmatpush3.bf16.msra.mxu0 %v3866_v43  ;;  %s4861_s24 = scalar_lea.hbm %s4978_s13, %s3473_s19  ;;  %p3882_p6 = scmp.ne.s32.totalorder %s4863_s12, %s3881_s7 }
 0xbd0   : > { %3645 = vmatmul.mubr.msk.bf16.vlgmr.msra.gmra.mrb[0].mxu1 %vm3018_vm11, %v3001_v62  ;;  %3660 = vmatprep.subr.bf16.mxu0 %v4005_v32  ;;  %p3889_p11 = scmp.lt.s32.totalorder %s3887_s17, %s3881_s7 }
 0xbd1   : > { %3649 = vmatpush3.bf16.msra.mxu1 %v3863_v58  ;;  %3652 = vmatprep.mubr.msk.bf16.mxu1 %vm4006_vm10, %v4005_v32  ;;  %p3883_p7 = pnand %p3882_p6, %p4154_p10 }
 0xbd2   : > { %3650 = vmatprep.subr.bf16.mxu1 %v4005_v32  ;;  %p3890_p13 = por %p3889_p11, %p3888_p9 }
 0xbd3   : > { %3661 = vmatpush3.bf16.msra.mxu0 %v3867_v35  ;;  %p3884_p8 = pneg %p3883_p7 }
 0xbd4   : > { %3662 = vmatprep.subr.bf16.mxu0 %v4005_v32 }
 0xbd5   : > { %3651 = vmatpush3.bf16.msra.mxu1 %v3864_v17  ;;  %p3891_p0 = pnand %p3890_p13, %p3884_p8 }
 0xbd7   : > { %3663 = vmatpush3.bf16.msra.mxu0 %v3868_v44 }
 0xbd8   : > { %3653 = vmatmul.mubr.msk.bf16.vlgmr.msra.gmra.mrb[4].mxu1 %vm3018_vm11, %v3001_v62  ;;  %3664 = vmatprep.subr.bf16.mxu0 %v4005_v32 }
 0xbdb   : > { %3665 = vmatpush3.bf16.msra.mxu0 %v3869_v11 }
 0xbdc   : > { %3666 = vmatprep.subr.bf16.mxu0 %v4005_v32 }
 0xbdf   : > { %3667 = vmatpush3.bf16.msra.mxu0 %v3870_v38 }
 0xbe0   : > { %3668 = vmatprep.subr.bf16.mxu0 %v4005_v32 }
 0xbe3   : > { %3669 = vmatpush3.bf16.msra.mxu0 %v3871_v56 }
 0xbe4   : > { %3670 = vmatprep.subr.bf16.mxu0 %v4005_v32 }
 0xbe7   : > { %3671 = vmatpush3.bf16.msra.mxu0 %v3872_v46 }
 0xca3   : > { %v3056_v47 = vpop.f32.mrb[0].mxu1 }
 0xca4   : > { %v3453_v48 = vmul.f32 -1.442695, %v3056_v47  ;;  %v3646_v50 = vpop.f32.mrb[1].mxu1 }
 0xca5   : > { %v3059_v14 = vpop.f32.mrb[2].mxu1 }
 0xca6   : > { %3873 = vpow2.f32 %v3453_v48  ;;  %v3454_v34 = vmul.f32 -1.442695, %v3059_v14  ;;  %v3647_v23 = vpop.f32.mrb[3].mxu1 }
 0xca8   : > { %3875 = vpow2.f32 %v3454_v34 }
 0xcab   : > { %v3113_v25 = vpop.f32.mrb[4].mxu1 }
 0xcac   : > { %v3654_v0 = vpop.f32.mrb[5].mxu1 }
 0xcad   : > { %v3116_v52 = vpop.f32.mrb[6].mxu1 }
 0xcae   : > { %v3655_v53 = vpop.f32.mrb[7].mxu1 }
 0xcb0   : > { %v3874_v41 = vpop.eup %3873 }
 0xcb1   : > { %v3126_v20 = vadd.f32 1.0, %v3874_v41 }
 0xcb2   : > { %v3876_v39 = vpop.eup %3875 }
 0xcb3   : > { %3877 = vrcp.f32 %v3126_v20  ;;  %v3127_v30 = vadd.f32 1.0, %v3876_v39 }
 0xcb5   : > { %3879 = vrcp.f32 %v3127_v30 }
 0xcbd   : > { %v3878_v55 = vpop.eup %3877 }
 0xcbe   : > { %v3132_v57 = vmul.f32 %v3878_v55, %v3056_v47 }
 0xcbf   : > { %v3880_v22 = vpop.eup %3879 }
 0xcc0   : > { %v3133_v54 = vmul.f32 %v3880_v22, %v3059_v14  ;;  %v3134_v60 = vmul.f32 %v3132_v57, %v3113_v25 }
 0xcc2   : > { %v3135_v19 = vmul.f32 %v3133_v54, %v3116_v52 }
 0xcc4   : > { %v3136_v6 = vpack.c.bf16 %v3135_v19, %v3134_v60 }
 0xcc6   : > { %3673 = vmatmul.mubr.bf16.vlgmr.msra.gmra.mrb[0].mxu0 %v3136_v6 }
 0xd99   : > { %v3237_v18 = vpop.f32.mrb[0].mxu0 }
 0xd9a   : > { %v3244_v45 = vadd.f32 %v3237_v18, %v3137_v59  ;;  %v3674_v31 = vpop.f32.mrb[1].mxu0 }
 0xd9b   : > { %v3240_v26 = vpop.f32.mrb[2].mxu0 }
 0xd9c   : > { %3246 = vst.msk [vmem:[%s4203_s15] sm:$0xff] %vm3018_vm11, %v3244_v45  ;;  %v3245_v51 = vadd.f32 %v3240_v26, %v3138_v2  ;;  %v3675_v49 = vpop.f32.mrb[3].mxu0 }
 0xd9e   : > { %3247 = vst.msk [vmem:[%s4203_s15 + $0x8] sm:$0xff] %vm3018_vm11, %v3245_v51 }
 0xd9f   : > { %3894 = shalt.err (!%p3891_p0)
}
 0xda0   : > { %s3895_s15 = scalar_lea.hbm %s4861_s24, 256  ;;  %s3899_s9 = scalar_lea.hbm %s4978_s13, 512 }
 0xda1   : > { %p3896_p1 = scmp.ne.s32.totalorder %s4861_s24, %s3895_s15  ;;  %p3900_p4 = scmp.lt.u32.totalorder %s4861_s24, %s4978_s13 }
 0xda2   : > { %p3901_p5 = scmp.lt.u32.totalorder %s3899_s9, %s3895_s15  ;;  %p3903_p7 = scmp.lt.u32.totalorder %s3895_s15, %s4861_s24 }
 0xda3   : > { %p3897_p2 = pnand %p3896_p1, %p4154_p10 }
 0xda4   : > { %p3902_p6 = por %p3901_p5, %p3900_p4 }
 0xda5   : > { %p3898_p3 = pneg %p3897_p2 }
 0xda6   : > { %p3904_p8 = por %p3903_p7, %p3902_p6 }
 0xda8   : > { %p3905_p9 = pnand %p3904_p8, %p3898_p3 }
 0xdaa   : > { %3908 = shalt.err (!%p3905_p9)
}
 0xdab   : > { %s4008_s16 = smov 128   ;;  %s4009_s27 = smov 8  }
 0xdac   : > { %3676 = dma.vmem_to_hbm [thread:$0]  (%p4154_p10), %s4863_s12, 256, %s4861_s24, %s4871_s5, %s4008_s16, %s4008_s16, %s4009_s27  }
 0xdad PF: > { %p3682_p11 = scmp.ge.s32.totalorder %s3991_s30, 2  ;;  %s3277_s7 = sand.u32 1, %s3955_s21  }
 0xdae   : > { %s3278_s14 = scalar_lea.sflag [#allocation6], %s3277_s7 }
 0xdaf   : > { %p3679_p13 = pnand %p3682_p11, %p4161_p12 }
 0xdb1   : > { %3950 = dma.done.wait (!%p3679_p13), %s3278_s14, 256  }
 0xdb2   : > { %3952 = vsyncadd (!%p3679_p13), %s3278_s14, 4294967040  ;;  %s25_s30 = sadd.s32 1, %s3991_s30   ;;  %s4980_s26 = sld [smem:[#allocation14_spill]] }
 0xdb3   : > { %p22_p0 = scmp.ge.s32.totalorder %s25_s30, 6   ;;  %s4981_s24 = sld [smem:[#allocation8_spill]] }
 0xdb4   : > { %s4982_s25 = sld [smem:[#allocation13_spill]]  ;;  %s4983_s4 = sld [smem:[#allocation9_spill]] }
 0xdb5   : > { %s4984_s27 = sld [smem:[#allocation10_spill]]  ;;  %s4985_s28 = sld [smem:[#allocation11_spill]] }
 0xdb6   : > { %s4986_s29 = sld [smem:[#allocation12_spill]]  ;;  %s4987_s21 = smov %s3959_s22 }
 0xdb7   : > { %s4988_s22 = smov %s3963_s23  ;;  %24 = sbr.rel (!%p22_p0) target bundleno = 12 (0xc), region = 208 }
 0xdb8   : > { %s4989_s23 = smov %s4980_s26 }
 0xdba   : > { %s4990_s26 = smov %s4983_s4 }
 0xdbe   :  { %3283 = vsyncpa [#allocation6], 1 }
 0xdbf   :  { %3285 = vsyncpa [#allocation6 + $0x1], 1 }

</bundles_post_ra>
